<compile_context>
chip_gen: v7x
topology: tpu7x:2x2x1
jax: 0.10.0
libtpu: 0.0.40
codegen_flags: <defaults>
</compile_context>

<pallas_src>
import functools
import math

import numpy as np
import jax
import jax.numpy as jnp
from jax.experimental import pallas as pl
from jax.experimental.pallas import tpu as pltpu


MAX_M_TILE = 2048     # per-step output-lane tile (multiple of 128)
LRELU_SLOPE = 0.2


# --------------------------- Pallas kernel bodies -------------------------- #

def gemm_lrelu_kernel(w_ref, p_ref, o_ref, *, apply_lrelu, slope):
    """out[Cout, tm] = w[Cout, K] @ patches^T[K, tm], fused leaky-ReLU.

    Lane-dense output: M (= N*Ho*Wo) sits on the 128-lane axis, the small Cout
    on sublanes.  bf16 operands, f32 MXU accumulation.
    """
    acc = jnp.dot(w_ref[...], p_ref[...], preferred_element_type=jnp.float32)
    if apply_lrelu:
        acc = jnp.where(acc > 0, acc, slope * acc)
    o_ref[...] = acc.astype(o_ref.dtype)


def tail_kernel(p3_ref, w3_ref, w4_ref, s4_ref, w5_ref, pool_ref, o_ref, *,
                taps, slope):
    """Fused conv3 + conv4 + conv5 + global average pool.

    p3_ref : [K3, M3]        conv3 im2col patches (bf16)
    w3_ref : [C3, K3]        conv3 weight (bf16)
    w4_ref : [taps, C4, C3]  conv4 weight, one [C4, C3] slab per (ky, kx) tap
    s4_ref : [taps, M3, M4]  0/1 selection matrices: patches4_tap = act3 @ s4[t]
    w5_ref : [C4, M4]        conv5 weight tiled over batch (f32)
    pool_ref: [M4, N]        per-batch column-group-sum matrix (f32)
    o_ref  : [1, N]          discriminator scores (f32)
    """
    # conv3 (lane-dense GEMM) + leaky-ReLU; activation stays in VMEM/regs.
    act3 = jnp.dot(w3_ref[...], p3_ref[...], preferred_element_type=jnp.float32)
    act3 = jnp.where(act3 > 0, act3, slope * act3).astype(jnp.bfloat16)   # [C3, M3]

    # conv4: in-kernel im2col via per-tap selection matmuls (dense MXU work,
    # no gathers/strided slices), accumulated in f32.
    acc4 = jnp.zeros((w4_ref.shape[1], s4_ref.shape[2]), jnp.float32)     # [C4, M4]
    for t in range(taps):
        gathered = jnp.dot(act3, s4_ref[t],
                           preferred_element_type=jnp.float32)            # [C3, M4]
        acc4 = acc4 + jnp.dot(w4_ref[t], gathered.astype(jnp.bfloat16),
                              preferred_element_type=jnp.float32)         # [C4, M4]
    act4 = jnp.where(acc4 > 0, acc4, slope * acc4)                         # [C4, M4]

    # conv5: its 4x4 window covers conv4's whole 4x4 output, so it reduces to
    # an elementwise multiply + per-batch reduction; AdaptiveAvgPool2d(1) over
    # the resulting 1x1 map is the identity.
    prod = act4 * w5_ref[...]                                              # [C4, M4]
    per_batch = jnp.dot(prod, pool_ref[...],
                        preferred_element_type=jnp.float32)                # [C4, N]
    o_ref[...] = jnp.sum(per_batch, axis=0, keepdims=True).astype(o_ref.dtype)


# ------------------------------ Pallas wrappers ---------------------------- #

def _round_up(x, m):
    return ((x + m - 1) // m) * m


def conv_gemm(w_mat, patches_t, *, apply_lrelu, out_dtype=jnp.bfloat16):
    """w_mat: [Cout, K] bf16, patches_t: [K, M] bf16 -> [Cout, M] out_dtype."""
    cout, k_dim = w_mat.shape
    _, m = patches_t.shape

    # >= 2 parallel grid steps whenever M >= 256 (v7x megacore sharding);
    # 128-aligned tiles, capped so double-buffered VMEM stays tiny on all gens.
    if m < 256:
        tm = m
    else:
        tm = min(MAX_M_TILE, _round_up(pl.cdiv(m, 2), 128))
    grid = (pl.cdiv(m, tm),)

    kernel = functools.partial(gemm_lrelu_kernel,
                               apply_lrelu=apply_lrelu, slope=LRELU_SLOPE)
    out_bytes = cout * m * jnp.dtype(out_dtype).itemsize
    cost = pl.CostEstimate(
        flops=2 * cout * k_dim * m,
        transcendentals=0,
        bytes_accessed=w_mat.size * 2 + patches_t.size * 2 + out_bytes)

    return pl.pallas_call(
        kernel,
        out_shape=jax.ShapeDtypeStruct((cout, m), out_dtype),
        grid=grid,
        in_specs=[
            pl.BlockSpec((cout, k_dim), lambda i: (0, 0)),   # weight resident
            pl.BlockSpec((k_dim, tm), lambda i: (0, i)),
        ],
        out_specs=pl.BlockSpec((cout, tm), lambda i: (0, i)),
        compiler_params=pltpu.CompilerParams(
            dimension_semantics=("parallel",)),
        cost_estimate=cost,
    )(w_mat, patches_t)


def fused_tail(p3, w3_mat, w4_taps, s4, w5_tiled, pool_mat):
    """Fused conv3 + conv4 + conv5 + global pool -> [1, N] scores."""
    taps, c4, c3 = w4_taps.shape
    k3, m3 = p3.shape
    m4, n = pool_mat.shape

    kernel = functools.partial(tail_kernel, taps=taps, slope=LRELU_SLOPE)
    flops = (2 * c3 * k3 * m3
             + taps * (2 * c3 * m3 * m4 + 2 * c4 * c3 * m4)
             + 2 * c4 * m4 * n)
    bytes_accessed = (p3.size * 2 + w3_mat.size * 2 + w4_taps.size * 2
                      + s4.size * 2 + w5_tiled.size * 4 + pool_mat.size * 4
                      + n * 4)
    cost = pl.CostEstimate(flops=flops, transcendentals=0,
                           bytes_accessed=bytes_accessed)

    return pl.pallas_call(
        kernel,
        out_shape=jax.ShapeDtypeStruct((1, n), jnp.float32),
        grid=(1,),
        in_specs=[
            pl.BlockSpec(p3.shape, lambda i: (0, 0)),
            pl.BlockSpec(w3_mat.shape, lambda i: (0, 0)),
            pl.BlockSpec(w4_taps.shape, lambda i: (0, 0, 0)),
            pl.BlockSpec(s4.shape, lambda i: (0, 0, 0)),
            pl.BlockSpec(w5_tiled.shape, lambda i: (0, 0)),
            pl.BlockSpec(pool_mat.shape, lambda i: (0, 0)),
        ],
        out_specs=pl.BlockSpec((1, n), lambda i: (0, 0)),
        compiler_params=pltpu.CompilerParams(
            dimension_semantics=("arbitrary",)),
        cost_estimate=cost,
    )(p3, w3_mat, w4_taps, s4, w5_tiled, pool_mat)


# --------------------------------- JAX glue -------------------------------- #

def im2col_t(x_cnhw, kh, kw, stride, pad):
    """[C, N, H, W] -> patches^T [KH*KW*C, N*Ho*Wo]; K order = (ky, kx, c)."""
    c, n, h, w = x_cnhw.shape
    xp = jnp.pad(x_cnhw, ((0, 0), (0, 0), (pad, pad), (pad, pad)))
    ho = (h + 2 * pad - kh) // stride + 1
    wo = (w + 2 * pad - kw) // stride + 1
    taps = []
    for ky in range(kh):
        for kx in range(kw):
            taps.append(jax.lax.slice(
                xp, (0, 0, ky, kx),
                (c, n, ky + stride * (ho - 1) + 1, kx + stride * (wo - 1) + 1),
                (1, 1, stride, stride)))            # [c, n, ho, wo]
    pt = jnp.stack(taps, axis=0)                    # [kh*kw, c, n, ho, wo]
    return pt.reshape(kh * kw * c, n * ho * wo), (ho, wo)


def build_conv4_selectors(n, h, w, kh=4, kw=4, stride=2, pad=1,
                          dtype=jnp.bfloat16):
    """0/1 matrices turning act3 [C3, n*h*w] into conv4 im2col taps (pads=0)."""
    ho = (h + 2 * pad - kh) // stride + 1
    wo = (w + 2 * pad - kw) // stride + 1
    sel = np.zeros((kh * kw, n * h * w, n * ho * wo), np.float32)
    for b in range(n):
        for i in range(ho):
            for j in range(wo):
                mo = (b * ho + i) * wo + j
                for ky in range(kh):
                    for kx in range(kw):
                        y = i * stride - pad + ky
                        x = j * stride - pad + kx
                        if 0 <= y < h and 0 <= x < w:
                            sel[ky * kw + kx, (b * h + y) * w + x, mo] = 1.0
    return jnp.asarray(sel, dtype), (ho, wo)


def prepare_params(weights, n, h, w):
    """One-time weight/constant preparation (hoisted out of the forward)."""
    w1, w2, w3, w4, w5 = weights

    def to_mat(wt):   # [Cout, Cin, KH, KW] -> [Cout, KH*KW*Cin], K = (ky, kx, c)
        cout, cin, kh, kw = wt.shape
        return (jnp.transpose(wt, (0, 2, 3, 1))
                .reshape(cout, kh * kw * cin).astype(jnp.bfloat16))

    w1m, w2m, w3m = to_mat(w1), to_mat(w2), to_mat(w3)

    # conv4 as per-tap [C4, C3] slabs, tap-major (ky, kx).
    c4, c3, kh, kw = w4.shape
    w4t = (jnp.transpose(w4, (2, 3, 0, 1))
           .reshape(kh * kw, c4, c3).astype(jnp.bfloat16))

    # conv3 output spatial (conv4 input): three stride-2 convs so far.
    h3, w3s = h // 8, w // 8
    s4, (h4, w4s) = build_conv4_selectors(n, h3, w3s)
    assert (h4, w4s) == (w5.shape[2], w5.shape[3]), (
        "fused tail assumes conv5's 4x4 window covers conv4's whole output "
        "(i.e. 64x64 inputs)")

    # conv5 weight tiled across batch: w5_tiled[c, b*16 + (y*4+x)] = w5[0,c,y,x]
    w5r = w5.reshape(w5.shape[1], h4 * w4s).astype(jnp.float32)   # [C4, 16]
    w5_tiled = jnp.tile(w5r, (1, n))                              # [C4, N*16]

    # Per-batch column-group sum (conv5 output is 1x1; avg-pool is identity).
    pool = np.zeros((n * h4 * w4s, n), np.float32)
    for b in range(n):
        pool[b * h4 * w4s:(b + 1) * h4 * w4s, b] = 1.0
    pool = jnp.asarray(pool)

    return (w1m, w2m, w3m, w4t, s4, w5_tiled, pool)


def spectral_normalize(w, key, n_iter=5, eps=1e-12):
    """Normalize conv weight [Cout, Cin, KH, KW] by its largest singular value."""
    cout = w.shape[0]
    w_mat = w.reshape(cout, -1)
    u = jax.random.normal(key, (cout,), jnp.float32)
    u = u / (jnp.linalg.norm(u) + eps)
    v = None
    for _ in range(n_iter):
        v = w_mat.T @ u
        v = v / (jnp.linalg.norm(v) + eps)
        u = w_mat @ v
        u = u / (jnp.linalg.norm(u) + eps)
    sigma = u @ (w_mat @ v)
    return w / sigma


def sngan_forward(x_nchw, params):
    """Forward pass matching SNGANDiscriminator.forward (bias-free convs)."""
    w1m, w2m, w3m, w4t, s4, w5_tiled, pool = params
    # NCHW -> [C, N, H, W]; inter-layer tensors keep this layout so each
    # kernel's [Cout, M] output feeds the next layer via a reshape only.
    x = jnp.transpose(x_nchw, (1, 0, 2, 3)).astype(jnp.bfloat16)
    n = x.shape[1]

    p1, (h1, w1s) = im2col_t(x, 4, 4, 2, 1)
    a1 = conv_gemm(w1m, p1, apply_lrelu=True).reshape(-1, n, h1, w1s)

    p2, (h2, w2s) = im2col_t(a1, 4, 4, 2, 1)
    a2 = conv_gemm(w2m, p2, apply_lrelu=True).reshape(-1, n, h2, w2s)

    p3, _ = im2col_t(a2, 4, 4, 2, 1)
    out = fused_tail(p3, w3m, w4t, s4, w5_tiled, pool)   # [1, N]
    return out.reshape(-1)                               # view(-1)


# ----------------------------------- main ---------------------------------- #

def init_conv_weight(key, cout, cin, kh=4, kw=4):
    # PyTorch Conv2d default: kaiming-uniform-ish bound ~ 1/sqrt(fan_in)
    fan_in = cin * kh * kw
    bound = 1.0 / math.sqrt(fan_in)
    return jax.random.uniform(key, (cout, cin, kh, kw), jnp.float32,
                              -bound, bound)


if __name__ == "__main__":
    key = jax.random.PRNGKey(0)
    keys = jax.random.split(key, 11)

    in_channels, num_features = 3, 4
    N, H, W = 2, 64, 64   # smallest spatial size valid for conv5 (k=4, s=1, p=0)

    x = jax.random.normal(keys[0], (N, in_channels, H, W), jnp.float32)

    channel_plan = [
        (num_features, in_channels),
        (num_features * 2, num_features),
        (num_features * 4, num_features * 2),
        (num_features * 8, num_features * 4),
        (1, num_features * 8),
    ]
    weights = []
    for i, (cout, cin) in enumerate(channel_plan):
        w = init_conv_weight(keys[1 + i], cout, cin)
        weights.append(spectral_normalize(w, keys[6 + i]))

    # Weight prep (repack / cast / selector constants) hoisted out of the
    # per-forward path; done once here.
    params = prepare_params(weights, N, H, W)

    forward = jax.jit(sngan_forward)
    out = jax.block_until_ready(forward(x, params))
    assert out.shape == (N,), out.shape
    assert bool(jnp.all(jnp.isfinite(out)))
    print("KERNEL_OK")
</pallas_src>

<mosaic_0001>
module attributes {stable_mosaic.version = 11 : i64} {
  func.func @gemm_lrelu_kernel(%arg0: i32, %arg1: memref<4x48xbf16, #tpu.memory_space<vmem>>, %arg2: memref<48x1024xbf16, #tpu.memory_space<vmem>>, %arg3: memref<4x1024xbf16, #tpu.memory_space<vmem>>) attributes {dimension_semantics = [#tpu.dimension_semantics<parallel>], iteration_bounds = array<i64: 2>, scalar_prefetch = 0 : i64, scratch_operands = 0 : i64, tpu.core_type = #tpu.core_type<tc>, window_params = [{pipeline_mode = #tpu.pipeline_mode<synchronous>, transform_indices = @transform_0, window_bounds = array<i64: 4, 48>}, {transform_indices = @transform_1, window_bounds = array<i64: 48, 1024>}, {transform_indices = @transform_2, window_bounds = array<i64: 4, 1024>}]} {
    %c0 = arith.constant 0 : index
    %c0_0 = arith.constant 0 : index
    %0 = vector.load %arg1[%c0, %c0_0] : memref<4x48xbf16, #tpu.memory_space<vmem>>, vector<4x48xbf16>
    %c0_1 = arith.constant 0 : index
    %c0_2 = arith.constant 0 : index
    %1 = vector.load %arg2[%c0_1, %c0_2] : memref<48x1024xbf16, #tpu.memory_space<vmem>>, vector<48x1024xbf16>
    %cst = arith.constant dense<0.000000e+00> : vector<4x1024xf32>
    %2 = tpu.matmul %0, %1, %cst {dimension_numbers = #tpu.dot_dimension_numbers<[1], [0], [0], [1], [0, 0, 1, 1], [], []>} : vector<4x48xbf16>, vector<48x1024xbf16>, vector<4x1024xf32> -> vector<4x1024xf32>
    %cst_3 = arith.constant 0.000000e+00 : f32
    %3 = vector.broadcast %cst_3 : f32 to vector<4x1024xf32>
    %4 = arith.cmpf ogt, %2, %3 : vector<4x1024xf32>
    %cst_4 = arith.constant 2.000000e-01 : f32
    %5 = vector.broadcast %cst_4 : f32 to vector<4x1024xf32>
    %6 = arith.mulf %5, %2 : vector<4x1024xf32>
    %7 = arith.select %4, %2, %6 : vector<4x1024xi1>, vector<4x1024xf32>
    %8 = arith.truncf %7 : vector<4x1024xf32> to vector<4x1024xbf16>
    %c0_5 = arith.constant 0 : index
    %c0_6 = arith.constant 0 : index
    %9 = vector.load %arg3[%c0_5, %c0_6] : memref<4x1024xbf16, #tpu.memory_space<vmem>>, vector<4x1024xbf16>
    tpu.vector_store %arg3[%c0_5, %c0_6], %8 {strides = array<i32>} : memref<4x1024xbf16, #tpu.memory_space<vmem>>, vector<4x1024xbf16>,
    return
  }
  func.func @transform_0(%arg0: i32) -> (i32, i32) {
    %c0_i32 = arith.constant 0 : i32
    %c0_i32_0 = arith.constant 0 : i32
    %c0_i32_1 = arith.constant 0 : i32
    return %c0_i32, %c0_i32_0 : i32, i32
  }
  func.func @transform_1(%arg0: i32) -> (i32, i32) {
    %c0_i32 = arith.constant 0 : i32
    %c0_i32_0 = arith.constant 0 : i32
    return %c0_i32, %arg0 : i32, i32
  }
  func.func @transform_2(%arg0: i32) -> (i32, i32) {
    %c0_i32 = arith.constant 0 : i32
    %c0_i32_0 = arith.constant 0 : i32
    return %c0_i32, %arg0 : i32, i32
  }
}

module attributes {stable_mosaic.version = 11 : i64} {
  func.func @gemm_lrelu_kernel(%arg0: i32, %arg1: memref<8x64xbf16, #tpu.memory_space<vmem>>, %arg2: memref<64x256xbf16, #tpu.memory_space<vmem>>, %arg3: memref<8x256xbf16, #tpu.memory_space<vmem>>) attributes {dimension_semantics = [#tpu.dimension_semantics<parallel>], iteration_bounds = array<i64: 2>, scalar_prefetch = 0 : i64, scratch_operands = 0 : i64, tpu.core_type = #tpu.core_type<tc>, window_params = [{pipeline_mode = #tpu.pipeline_mode<synchronous>, transform_indices = @transform_0, window_bounds = array<i64: 8, 64>}, {transform_indices = @transform_1, window_bounds = array<i64: 64, 256>}, {transform_indices = @transform_2, window_bounds = array<i64: 8, 256>}]} {
    %c0 = arith.constant 0 : index
    %c0_0 = arith.constant 0 : index
    %0 = vector.load %arg1[%c0, %c0_0] : memref<8x64xbf16, #tpu.memory_space<vmem>>, vector<8x64xbf16>
    %c0_1 = arith.constant 0 : index
    %c0_2 = arith.constant 0 : index
    %1 = vector.load %arg2[%c0_1, %c0_2] : memref<64x256xbf16, #tpu.memory_space<vmem>>, vector<64x256xbf16>
    %cst = arith.constant dense<0.000000e+00> : vector<8x256xf32>
    %2 = tpu.matmul %0, %1, %cst {dimension_numbers = #tpu.dot_dimension_numbers<[1], [0], [0], [1], [0, 0, 1, 1], [], []>} : vector<8x64xbf16>, vector<64x256xbf16>, vector<8x256xf32> -> vector<8x256xf32>
    %cst_3 = arith.constant 0.000000e+00 : f32
    %3 = vector.broadcast %cst_3 : f32 to vector<8x256xf32>
    %4 = arith.cmpf ogt, %2, %3 : vector<8x256xf32>
    %cst_4 = arith.constant 2.000000e-01 : f32
    %5 = vector.broadcast %cst_4 : f32 to vector<8x256xf32>
    %6 = arith.mulf %5, %2 : vector<8x256xf32>
    %7 = arith.select %4, %2, %6 : vector<8x256xi1>, vector<8x256xf32>
    %8 = arith.truncf %7 : vector<8x256xf32> to vector<8x256xbf16>
    %c0_5 = arith.constant 0 : index
    %c0_6 = arith.constant 0 : index
    %9 = vector.load %arg3[%c0_5, %c0_6] : memref<8x256xbf16, #tpu.memory_space<vmem>>, vector<8x256xbf16>
    tpu.vector_store %arg3[%c0_5, %c0_6], %8 {strides = array<i32>} : memref<8x256xbf16, #tpu.memory_space<vmem>>, vector<8x256xbf16>,
    return
  }
  func.func @transform_0(%arg0: i32) -> (i32, i32) {
    %c0_i32 = arith.constant 0 : i32
    %c0_i32_0 = arith.constant 0 : i32
    %c0_i32_1 = arith.constant 0 : i32
    return %c0_i32, %c0_i32_0 : i32, i32
  }
  func.func @transform_1(%arg0: i32) -> (i32, i32) {
    %c0_i32 = arith.constant 0 : i32
    %c0_i32_0 = arith.constant 0 : i32
    return %c0_i32, %arg0 : i32, i32
  }
  func.func @transform_2(%arg0: i32) -> (i32, i32) {
    %c0_i32 = arith.constant 0 : i32
    %c0_i32_0 = arith.constant 0 : i32
    return %c0_i32, %arg0 : i32, i32
  }
}

module attributes {stable_mosaic.version = 11 : i64} {
  func.func @tail_kernel(%arg0: i32, %arg1: memref<128x128xbf16, #tpu.memory_space<vmem>>, %arg2: memref<16x128xbf16, #tpu.memory_space<vmem>>, %arg3: memref<16x32x16xbf16, #tpu.memory_space<vmem>>, %arg4: memref<16x128x32xbf16, #tpu.memory_space<vmem>>, %arg5: memref<32x32xf32, #tpu.memory_space<vmem>>, %arg6: memref<32x2xf32, #tpu.memory_space<vmem>>, %arg7: memref<1x2xf32, #tpu.memory_space<vmem>>) attributes {dimension_semantics = [#tpu.dimension_semantics<arbitrary>], iteration_bounds = array<i64: 1>, scalar_prefetch = 0 : i64, scratch_operands = 0 : i64, tpu.core_type = #tpu.core_type<tc>, window_params = [{pipeline_mode = #tpu.pipeline_mode<synchronous>, transform_indices = @transform_0, window_bounds = array<i64: 128, 128>}, {pipeline_mode = #tpu.pipeline_mode<synchronous>, transform_indices = @transform_1, window_bounds = array<i64: 16, 128>}, {pipeline_mode = #tpu.pipeline_mode<synchronous>, transform_indices = @transform_2, window_bounds = array<i64: 16, 32, 16>}, {pipeline_mode = #tpu.pipeline_mode<synchronous>, transform_indices = @transform_3, window_bounds = array<i64: 16, 128, 32>}, {pipeline_mode = #tpu.pipeline_mode<synchronous>, transform_indices = @transform_4, window_bounds = array<i64: 32, 32>}, {pipeline_mode = #tpu.pipeline_mode<synchronous>, transform_indices = @transform_5, window_bounds = array<i64: 32, 2>}, {pipeline_mode = #tpu.pipeline_mode<synchronous>, transform_indices = @transform_6, window_bounds = array<i64: 1, 2>}]} {
    %c0 = arith.constant 0 : index
    %c0_0 = arith.constant 0 : index
    %0 = vector.load %arg2[%c0, %c0_0] : memref<16x128xbf16, #tpu.memory_space<vmem>>, vector<16x128xbf16>
    %c0_1 = arith.constant 0 : index
    %c0_2 = arith.constant 0 : index
    %1 = vector.load %arg1[%c0_1, %c0_2] : memref<128x128xbf16, #tpu.memory_space<vmem>>, vector<128x128xbf16>
    %cst = arith.constant dense<0.000000e+00> : vector<16x128xf32>
    %2 = tpu.matmul %0, %1, %cst {dimension_numbers = #tpu.dot_dimension_numbers<[1], [0], [0], [1], [0, 0, 1, 1], [], []>} : vector<16x128xbf16>, vector<128x128xbf16>, vector<16x128xf32> -> vector<16x128xf32>
    %cst_3 = arith.constant 0.000000e+00 : f32
    %3 = vector.broadcast %cst_3 : f32 to vector<16x128xf32>
    %4 = arith.cmpf ogt, %2, %3 : vector<16x128xf32>
    %cst_4 = arith.constant 2.000000e-01 : f32
    %5 = vector.broadcast %cst_4 : f32 to vector<16x128xf32>
    %6 = arith.mulf %5, %2 : vector<16x128xf32>
    %7 = arith.select %4, %2, %6 : vector<16x128xi1>, vector<16x128xf32>
    %8 = arith.truncf %7 : vector<16x128xf32> to vector<16x128xbf16>
    %cst_5 = arith.constant 0.000000e+00 : f32
    %9 = vector.broadcast %cst_5 : f32 to vector<32x32xf32>
    %c0_6 = arith.constant 0 : index
    %c0_7 = arith.constant 0 : index
    %c0_8 = arith.constant 0 : index
    %10 = vector.load %arg4[%c0_6, %c0_7, %c0_8] : memref<16x128x32xbf16, #tpu.memory_space<vmem>>, vector<1x128x32xbf16>
    %11 = vector.shape_cast %10 : vector<1x128x32xbf16> to vector<128x32xbf16>
    %cst_9 = arith.constant dense<0.000000e+00> : vector<16x32xf32>
    %12 = tpu.matmul %8, %11, %cst_9 {dimension_numbers = #tpu.dot_dimension_numbers<[1], [0], [0], [1], [0, 0, 1, 1], [], []>} : vector<16x128xbf16>, vector<128x32xbf16>, vector<16x32xf32> -> vector<16x32xf32>
    %c0_10 = arith.constant 0 : index
    %c0_11 = arith.constant 0 : index
    %c0_12 = arith.constant 0 : index
    %13 = vector.load %arg3[%c0_10, %c0_11, %c0_12] : memref<16x32x16xbf16, #tpu.memory_space<vmem>>, vector<1x32x16xbf16>
    %14 = vector.shape_cast %13 : vector<1x32x16xbf16> to vector<32x16xbf16>
    %15 = arith.truncf %12 : vector<16x32xf32> to vector<16x32xbf16>
    %cst_13 = arith.constant dense<0.000000e+00> : vector<32x32xf32>
    %16 = tpu.matmul %14, %15, %cst_13 {dimension_numbers = #tpu.dot_dimension_numbers<[1], [0], [0], [1], [0, 0, 1, 1], [], []>} : vector<32x16xbf16>, vector<16x32xbf16>, vector<32x32xf32> -> vector<32x32xf32>
    %17 = arith.addf %9, %16 : vector<32x32xf32>
    %c1 = arith.constant 1 : index
    %c0_14 = arith.constant 0 : index
    %c0_15 = arith.constant 0 : index
    %18 = vector.load %arg4[%c1, %c0_14, %c0_15] : memref<16x128x32xbf16, #tpu.memory_space<vmem>>, vector<1x128x32xbf16>
    %19 = vector.shape_cast %18 : vector<1x128x32xbf16> to vector<128x32xbf16>
    %cst_16 = arith.constant dense<0.000000e+00> : vector<16x32xf32>
    %20 = tpu.matmul %8, %19, %cst_16 {dimension_numbers = #tpu.dot_dimension_numbers<[1], [0], [0], [1], [0, 0, 1, 1], [], []>} : vector<16x128xbf16>, vector<128x32xbf16>, vector<16x32xf32> -> vector<16x32xf32>
    %c1_17 = arith.constant 1 : index
    %c0_18 = arith.constant 0 : index
    %c0_19 = arith.constant 0 : index
    %21 = vector.load %arg3[%c1_17, %c0_18, %c0_19] : memref<16x32x16xbf16, #tpu.memory_space<vmem>>, vector<1x32x16xbf16>
    %22 = vector.shape_cast %21 : vector<1x32x16xbf16> to vector<32x16xbf16>
    %23 = arith.truncf %20 : vector<16x32xf32> to vector<16x32xbf16>
    %cst_20 = arith.constant dense<0.000000e+00> : vector<32x32xf32>
    %24 = tpu.matmul %22, %23, %cst_20 {dimension_numbers = #tpu.dot_dimension_numbers<[1], [0], [0], [1], [0, 0, 1, 1], [], []>} : vector<32x16xbf16>, vector<16x32xbf16>, vector<32x32xf32> -> vector<32x32xf32>
    %25 = arith.addf %17, %24 : vector<32x32xf32>
    %c2 = arith.constant 2 : index
    %c0_21 = arith.constant 0 : index
    %c0_22 = arith.constant 0 : index
    %26 = vector.load %arg4[%c2, %c0_21, %c0_22] : memref<16x128x32xbf16, #tpu.memory_space<vmem>>, vector<1x128x32xbf16>
    %27 = vector.shape_cast %26 : vector<1x128x32xbf16> to vector<128x32xbf16>
    %cst_23 = arith.constant dense<0.000000e+00> : vector<16x32xf32>
    %28 = tpu.matmul %8, %27, %cst_23 {dimension_numbers = #tpu.dot_dimension_numbers<[1], [0], [0], [1], [0, 0, 1, 1], [], []>} : vector<16x128xbf16>, vector<128x32xbf16>, vector<16x32xf32> -> vector<16x32xf32>
    %c2_24 = arith.constant 2 : index
    %c0_25 = arith.constant 0 : index
    %c0_26 = arith.constant 0 : index
    %29 = vector.load %arg3[%c2_24, %c0_25, %c0_26] : memref<16x32x16xbf16, #tpu.memory_space<vmem>>, vector<1x32x16xbf16>
    %30 = vector.shape_cast %29 : vector<1x32x16xbf16> to vector<32x16xbf16>
    %31 = arith.truncf %28 : vector<16x32xf32> to vector<16x32xbf16>
    %cst_27 = arith.constant dense<0.000000e+00> : vector<32x32xf32>
    %32 = tpu.matmul %30, %31, %cst_27 {dimension_numbers = #tpu.dot_dimension_numbers<[1], [0], [0], [1], [0, 0, 1, 1], [], []>} : vector<32x16xbf16>, vector<16x32xbf16>, vector<32x32xf32> -> vector<32x32xf32>
    %33 = arith.addf %25, %32 : vector<32x32xf32>
    %c3 = arith.constant 3 : index
    %c0_28 = arith.constant 0 : index
    %c0_29 = arith.constant 0 : index
    %34 = vector.load %arg4[%c3, %c0_28, %c0_29] : memref<16x128x32xbf16, #tpu.memory_space<vmem>>, vector<1x128x32xbf16>
    %35 = vector.shape_cast %34 : vector<1x128x32xbf16> to vector<128x32xbf16>
    %cst_30 = arith.constant dense<0.000000e+00> : vector<16x32xf32>
    %36 = tpu.matmul %8, %35, %cst_30 {dimension_numbers = #tpu.dot_dimension_numbers<[1], [0], [0], [1], [0, 0, 1, 1], [], []>} : vector<16x128xbf16>, vector<128x32xbf16>, vector<16x32xf32> -> vector<16x32xf32>
    %c3_31 = arith.constant 3 : index
    %c0_32 = arith.constant 0 : index
    %c0_33 = arith.constant 0 : index
    %37 = vector.load %arg3[%c3_31, %c0_32, %c0_33] : memref<16x32x16xbf16, #tpu.memory_space<vmem>>, vector<1x32x16xbf16>
    %38 = vector.shape_cast %37 : vector<1x32x16xbf16> to vector<32x16xbf16>
    %39 = arith.truncf %36 : vector<16x32xf32> to vector<16x32xbf16>
    %cst_34 = arith.constant dense<0.000000e+00> : vector<32x32xf32>
    %40 = tpu.matmul %38, %39, %cst_34 {dimension_numbers = #tpu.dot_dimension_numbers<[1], [0], [0], [1], [0, 0, 1, 1], [], []>} : vector<32x16xbf16>, vector<16x32xbf16>, vector<32x32xf32> -> vector<32x32xf32>
    %41 = arith.addf %33, %40 : vector<32x32xf32>
    %c4 = arith.constant 4 : index
    %c0_35 = arith.constant 0 : index
    %c0_36 = arith.constant 0 : index
    %42 = vector.load %arg4[%c4, %c0_35, %c0_36] : memref<16x128x32xbf16, #tpu.memory_space<vmem>>, vector<1x128x32xbf16>
    %43 = vector.shape_cast %42 : vector<1x128x32xbf16> to vector<128x32xbf16>
    %cst_37 = arith.constant dense<0.000000e+00> : vector<16x32xf32>
    %44 = tpu.matmul %8, %43, %cst_37 {dimension_numbers = #tpu.dot_dimension_numbers<[1], [0], [0], [1], [0, 0, 1, 1], [], []>} : vector<16x128xbf16>, vector<128x32xbf16>, vector<16x32xf32> -> vector<16x32xf32>
    %c4_38 = arith.constant 4 : index
    %c0_39 = arith.constant 0 : index
    %c0_40 = arith.constant 0 : index
    %45 = vector.load %arg3[%c4_38, %c0_39, %c0_40] : memref<16x32x16xbf16, #tpu.memory_space<vmem>>, vector<1x32x16xbf16>
    %46 = vector.shape_cast %45 : vector<1x32x16xbf16> to vector<32x16xbf16>
    %47 = arith.truncf %44 : vector<16x32xf32> to vector<16x32xbf16>
    %cst_41 = arith.constant dense<0.000000e+00> : vector<32x32xf32>
    %48 = tpu.matmul %46, %47, %cst_41 {dimension_numbers = #tpu.dot_dimension_numbers<[1], [0], [0], [1], [0, 0, 1, 1], [], []>} : vector<32x16xbf16>, vector<16x32xbf16>, vector<32x32xf32> -> vector<32x32xf32>
    %49 = arith.addf %41, %48 : vector<32x32xf32>
    %c5 = arith.constant 5 : index
    %c0_42 = arith.constant 0 : index
    %c0_43 = arith.constant 0 : index
    %50 = vector.load %arg4[%c5, %c0_42, %c0_43] : memref<16x128x32xbf16, #tpu.memory_space<vmem>>, vector<1x128x32xbf16>
    %51 = vector.shape_cast %50 : vector<1x128x32xbf16> to vector<128x32xbf16>
    %cst_44 = arith.constant dense<0.000000e+00> : vector<16x32xf32>
    %52 = tpu.matmul %8, %51, %cst_44 {dimension_numbers = #tpu.dot_dimension_numbers<[1], [0], [0], [1], [0, 0, 1, 1], [], []>} : vector<16x128xbf16>, vector<128x32xbf16>, vector<16x32xf32> -> vector<16x32xf32>
    %c5_45 = arith.constant 5 : index
    %c0_46 = arith.constant 0 : index
    %c0_47 = arith.constant 0 : index
    %53 = vector.load %arg3[%c5_45, %c0_46, %c0_47] : memref<16x32x16xbf16, #tpu.memory_space<vmem>>, vector<1x32x16xbf16>
    %54 = vector.shape_cast %53 : vector<1x32x16xbf16> to vector<32x16xbf16>
    %55 = arith.truncf %52 : vector<16x32xf32> to vector<16x32xbf16>
    %cst_48 = arith.constant dense<0.000000e+00> : vector<32x32xf32>
    %56 = tpu.matmul %54, %55, %cst_48 {dimension_numbers = #tpu.dot_dimension_numbers<[1], [0], [0], [1], [0, 0, 1, 1], [], []>} : vector<32x16xbf16>, vector<16x32xbf16>, vector<32x32xf32> -> vector<32x32xf32>
    %57 = arith.addf %49, %56 : vector<32x32xf32>
    %c6 = arith.constant 6 : index
    %c0_49 = arith.constant 0 : index
    %c0_50 = arith.constant 0 : index
    %58 = vector.load %arg4[%c6, %c0_49, %c0_50] : memref<16x128x32xbf16, #tpu.memory_space<vmem>>, vector<1x128x32xbf16>
    %59 = vector.shape_cast %58 : vector<1x128x32xbf16> to vector<128x32xbf16>
    %cst_51 = arith.constant dense<0.000000e+00> : vector<16x32xf32>
    %60 = tpu.matmul %8, %59, %cst_51 {dimension_numbers = #tpu.dot_dimension_numbers<[1], [0], [0], [1], [0, 0, 1, 1], [], []>} : vector<16x128xbf16>, vector<128x32xbf16>, vector<16x32xf32> -> vector<16x32xf32>
    %c6_52 = arith.constant 6 : index
    %c0_53 = arith.constant 0 : index
    %c0_54 = arith.constant 0 : index
    %61 = vector.load %arg3[%c6_52, %c0_53, %c0_54] : memref<16x32x16xbf16, #tpu.memory_space<vmem>>, vector<1x32x16xbf16>
    %62 = vector.shape_cast %61 : vector<1x32x16xbf16> to vector<32x16xbf16>
    %63 = arith.truncf %60 : vector<16x32xf32> to vector<16x32xbf16>
    %cst_55 = arith.constant dense<0.000000e+00> : vector<32x32xf32>
    %64 = tpu.matmul %62, %63, %cst_55 {dimension_numbers = #tpu.dot_dimension_numbers<[1], [0], [0], [1], [0, 0, 1, 1], [], []>} : vector<32x16xbf16>, vector<16x32xbf16>, vector<32x32xf32> -> vector<32x32xf32>
    %65 = arith.addf %57, %64 : vector<32x32xf32>
    %c7 = arith.constant 7 : index
    %c0_56 = arith.constant 0 : index
    %c0_57 = arith.constant 0 : index
    %66 = vector.load %arg4[%c7, %c0_56, %c0_57] : memref<16x128x32xbf16, #tpu.memory_space<vmem>>, vector<1x128x32xbf16>
    %67 = vector.shape_cast %66 : vector<1x128x32xbf16> to vector<128x32xbf16>
    %cst_58 = arith.constant dense<0.000000e+00> : vector<16x32xf32>
    %68 = tpu.matmul %8, %67, %cst_58 {dimension_numbers = #tpu.dot_dimension_numbers<[1], [0], [0], [1], [0, 0, 1, 1], [], []>} : vector<16x128xbf16>, vector<128x32xbf16>, vector<16x32xf32> -> vector<16x32xf32>
    %c7_59 = arith.constant 7 : index
    %c0_60 = arith.constant 0 : index
    %c0_61 = arith.constant 0 : index
    %69 = vector.load %arg3[%c7_59, %c0_60, %c0_61] : memref<16x32x16xbf16, #tpu.memory_space<vmem>>, vector<1x32x16xbf16>
    %70 = vector.shape_cast %69 : vector<1x32x16xbf16> to vector<32x16xbf16>
    %71 = arith.truncf %68 : vector<16x32xf32> to vector<16x32xbf16>
    %cst_62 = arith.constant dense<0.000000e+00> : vector<32x32xf32>
    %72 = tpu.matmul %70, %71, %cst_62 {dimension_numbers = #tpu.dot_dimension_numbers<[1], [0], [0], [1], [0, 0, 1, 1], [], []>} : vector<32x16xbf16>, vector<16x32xbf16>, vector<32x32xf32> -> vector<32x32xf32>
    %73 = arith.addf %65, %72 : vector<32x32xf32>
    %c8 = arith.constant 8 : index
    %c0_63 = arith.constant 0 : index
    %c0_64 = arith.constant 0 : index
    %74 = vector.load %arg4[%c8, %c0_63, %c0_64] : memref<16x128x32xbf16, #tpu.memory_space<vmem>>, vector<1x128x32xbf16>
    %75 = vector.shape_cast %74 : vector<1x128x32xbf16> to vector<128x32xbf16>
    %cst_65 = arith.constant dense<0.000000e+00> : vector<16x32xf32>
    %76 = tpu.matmul %8, %75, %cst_65 {dimension_numbers = #tpu.dot_dimension_numbers<[1], [0], [0], [1], [0, 0, 1, 1], [], []>} : vector<16x128xbf16>, vector<128x32xbf16>, vector<16x32xf32> -> vector<16x32xf32>
    %c8_66 = arith.constant 8 : index
    %c0_67 = arith.constant 0 : index
    %c0_68 = arith.constant 0 : index
    %77 = vector.load %arg3[%c8_66, %c0_67, %c0_68] : memref<16x32x16xbf16, #tpu.memory_space<vmem>>, vector<1x32x16xbf16>
    %78 = vector.shape_cast %77 : vector<1x32x16xbf16> to vector<32x16xbf16>
    %79 = arith.truncf %76 : vector<16x32xf32> to vector<16x32xbf16>
    %cst_69 = arith.constant dense<0.000000e+00> : vector<32x32xf32>
    %80 = tpu.matmul %78, %79, %cst_69 {dimension_numbers = #tpu.dot_dimension_numbers<[1], [0], [0], [1], [0, 0, 1, 1], [], []>} : vector<32x16xbf16>, vector<16x32xbf16>, vector<32x32xf32> -> vector<32x32xf32>
    %81 = arith.addf %73, %80 : vector<32x32xf32>
    %c9 = arith.constant 9 : index
    %c0_70 = arith.constant 0 : index
    %c0_71 = arith.constant 0 : index
    %82 = vector.load %arg4[%c9, %c0_70, %c0_71] : memref<16x128x32xbf16, #tpu.memory_space<vmem>>, vector<1x128x32xbf16>
    %83 = vector.shape_cast %82 : vector<1x128x32xbf16> to vector<128x32xbf16>
    %cst_72 = arith.constant dense<0.000000e+00> : vector<16x32xf32>
    %84 = tpu.matmul %8, %83, %cst_72 {dimension_numbers = #tpu.dot_dimension_numbers<[1], [0], [0], [1], [0, 0, 1, 1], [], []>} : vector<16x128xbf16>, vector<128x32xbf16>, vector<16x32xf32> -> vector<16x32xf32>
    %c9_73 = arith.constant 9 : index
    %c0_74 = arith.constant 0 : index
    %c0_75 = arith.constant 0 : index
    %85 = vector.load %arg3[%c9_73, %c0_74, %c0_75] : memref<16x32x16xbf16, #tpu.memory_space<vmem>>, vector<1x32x16xbf16>
    %86 = vector.shape_cast %85 : vector<1x32x16xbf16> to vector<32x16xbf16>
    %87 = arith.truncf %84 : vector<16x32xf32> to vector<16x32xbf16>
    %cst_76 = arith.constant dense<0.000000e+00> : vector<32x32xf32>
    %88 = tpu.matmul %86, %87, %cst_76 {dimension_numbers = #tpu.dot_dimension_numbers<[1], [0], [0], [1], [0, 0, 1, 1], [], []>} : vector<32x16xbf16>, vector<16x32xbf16>, vector<32x32xf32> -> vector<32x32xf32>
    %89 = arith.addf %81, %88 : vector<32x32xf32>
    %c10 = arith.constant 10 : index
    %c0_77 = arith.constant 0 : index
    %c0_78 = arith.constant 0 : index
    %90 = vector.load %arg4[%c10, %c0_77, %c0_78] : memref<16x128x32xbf16, #tpu.memory_space<vmem>>, vector<1x128x32xbf16>
    %91 = vector.shape_cast %90 : vector<1x128x32xbf16> to vector<128x32xbf16>
    %cst_79 = arith.constant dense<0.000000e+00> : vector<16x32xf32>
    %92 = tpu.matmul %8, %91, %cst_79 {dimension_numbers = #tpu.dot_dimension_numbers<[1], [0], [0], [1], [0, 0, 1, 1], [], []>} : vector<16x128xbf16>, vector<128x32xbf16>, vector<16x32xf32> -> vector<16x32xf32>
    %c10_80 = arith.constant 10 : index
    %c0_81 = arith.constant 0 : index
    %c0_82 = arith.constant 0 : index
    %93 = vector.load %arg3[%c10_80, %c0_81, %c0_82] : memref<16x32x16xbf16, #tpu.memory_space<vmem>>, vector<1x32x16xbf16>
    %94 = vector.shape_cast %93 : vector<1x32x16xbf16> to vector<32x16xbf16>
    %95 = arith.truncf %92 : vector<16x32xf32> to vector<16x32xbf16>
    %cst_83 = arith.constant dense<0.000000e+00> : vector<32x32xf32>
    %96 = tpu.matmul %94, %95, %cst_83 {dimension_numbers = #tpu.dot_dimension_numbers<[1], [0], [0], [1], [0, 0, 1, 1], [], []>} : vector<32x16xbf16>, vector<16x32xbf16>, vector<32x32xf32> -> vector<32x32xf32>
    %97 = arith.addf %89, %96 : vector<32x32xf32>
    %c11 = arith.constant 11 : index
    %c0_84 = arith.constant 0 : index
    %c0_85 = arith.constant 0 : index
    %98 = vector.load %arg4[%c11, %c0_84, %c0_85] : memref<16x128x32xbf16, #tpu.memory_space<vmem>>, vector<1x128x32xbf16>
    %99 = vector.shape_cast %98 : vector<1x128x32xbf16> to vector<128x32xbf16>
    %cst_86 = arith.constant dense<0.000000e+00> : vector<16x32xf32>
    %100 = tpu.matmul %8, %99, %cst_86 {dimension_numbers = #tpu.dot_dimension_numbers<[1], [0], [0], [1], [0, 0, 1, 1], [], []>} : vector<16x128xbf16>, vector<128x32xbf16>, vector<16x32xf32> -> vector<16x32xf32>
    %c11_87 = arith.constant 11 : index
    %c0_88 = arith.constant 0 : index
    %c0_89 = arith.constant 0 : index
    %101 = vector.load %arg3[%c11_87, %c0_88, %c0_89] : memref<16x32x16xbf16, #tpu.memory_space<vmem>>, vector<1x32x16xbf16>
    %102 = vector.shape_cast %101 : vector<1x32x16xbf16> to vector<32x16xbf16>
    %103 = arith.truncf %100 : vector<16x32xf32> to vector<16x32xbf16>
    %cst_90 = arith.constant dense<0.000000e+00> : vector<32x32xf32>
    %104 = tpu.matmul %102, %103, %cst_90 {dimension_numbers = #tpu.dot_dimension_numbers<[1], [0], [0], [1], [0, 0, 1, 1], [], []>} : vector<32x16xbf16>, vector<16x32xbf16>, vector<32x32xf32> -> vector<32x32xf32>
    %105 = arith.addf %97, %104 : vector<32x32xf32>
    %c12 = arith.constant 12 : index
    %c0_91 = arith.constant 0 : index
    %c0_92 = arith.constant 0 : index
    %106 = vector.load %arg4[%c12, %c0_91, %c0_92] : memref<16x128x32xbf16, #tpu.memory_space<vmem>>, vector<1x128x32xbf16>
    %107 = vector.shape_cast %106 : vector<1x128x32xbf16> to vector<128x32xbf16>
    %cst_93 = arith.constant dense<0.000000e+00> : vector<16x32xf32>
    %108 = tpu.matmul %8, %107, %cst_93 {dimension_numbers = #tpu.dot_dimension_numbers<[1], [0], [0], [1], [0, 0, 1, 1], [], []>} : vector<16x128xbf16>, vector<128x32xbf16>, vector<16x32xf32> -> vector<16x32xf32>
    %c12_94 = arith.constant 12 : index
    %c0_95 = arith.constant 0 : index
    %c0_96 = arith.constant 0 : index
    %109 = vector.load %arg3[%c12_94, %c0_95, %c0_96] : memref<16x32x16xbf16, #tpu.memory_space<vmem>>, vector<1x32x16xbf16>
    %110 = vector.shape_cast %109 : vector<1x32x16xbf16> to vector<32x16xbf16>
    %111 = arith.truncf %108 : vector<16x32xf32> to vector<16x32xbf16>
    %cst_97 = arith.constant dense<0.000000e+00> : vector<32x32xf32>
    %112 = tpu.matmul %110, %111, %cst_97 {dimension_numbers = #tpu.dot_dimension_numbers<[1], [0], [0], [1], [0, 0, 1, 1], [], []>} : vector<32x16xbf16>, vector<16x32xbf16>, vector<32x32xf32> -> vector<32x32xf32>
    %113 = arith.addf %105, %112 : vector<32x32xf32>
    %c13 = arith.constant 13 : index
    %c0_98 = arith.constant 0 : index
    %c0_99 = arith.constant 0 : index
    %114 = vector.load %arg4[%c13, %c0_98, %c0_99] : memref<16x128x32xbf16, #tpu.memory_space<vmem>>, vector<1x128x32xbf16>
    %115 = vector.shape_cast %114 : vector<1x128x32xbf16> to vector<128x32xbf16>
    %cst_100 = arith.constant dense<0.000000e+00> : vector<16x32xf32>
    %116 = tpu.matmul %8, %115, %cst_100 {dimension_numbers = #tpu.dot_dimension_numbers<[1], [0], [0], [1], [0, 0, 1, 1], [], []>} : vector<16x128xbf16>, vector<128x32xbf16>, vector<16x32xf32> -> vector<16x32xf32>
    %c13_101 = arith.constant 13 : index
    %c0_102 = arith.constant 0 : index
    %c0_103 = arith.constant 0 : index
    %117 = vector.load %arg3[%c13_101, %c0_102, %c0_103] : memref<16x32x16xbf16, #tpu.memory_space<vmem>>, vector<1x32x16xbf16>
    %118 = vector.shape_cast %117 : vector<1x32x16xbf16> to vector<32x16xbf16>
    %119 = arith.truncf %116 : vector<16x32xf32> to vector<16x32xbf16>
    %cst_104 = arith.constant dense<0.000000e+00> : vector<32x32xf32>
    %120 = tpu.matmul %118, %119, %cst_104 {dimension_numbers = #tpu.dot_dimension_numbers<[1], [0], [0], [1], [0, 0, 1, 1], [], []>} : vector<32x16xbf16>, vector<16x32xbf16>, vector<32x32xf32> -> vector<32x32xf32>
    %121 = arith.addf %113, %120 : vector<32x32xf32>
    %c14 = arith.constant 14 : index
    %c0_105 = arith.constant 0 : index
    %c0_106 = arith.constant 0 : index
    %122 = vector.load %arg4[%c14, %c0_105, %c0_106] : memref<16x128x32xbf16, #tpu.memory_space<vmem>>, vector<1x128x32xbf16>
    %123 = vector.shape_cast %122 : vector<1x128x32xbf16> to vector<128x32xbf16>
    %cst_107 = arith.constant dense<0.000000e+00> : vector<16x32xf32>
    %124 = tpu.matmul %8, %123, %cst_107 {dimension_numbers = #tpu.dot_dimension_numbers<[1], [0], [0], [1], [0, 0, 1, 1], [], []>} : vector<16x128xbf16>, vector<128x32xbf16>, vector<16x32xf32> -> vector<16x32xf32>
    %c14_108 = arith.constant 14 : index
    %c0_109 = arith.constant 0 : index
    %c0_110 = arith.constant 0 : index
    %125 = vector.load %arg3[%c14_108, %c0_109, %c0_110] : memref<16x32x16xbf16, #tpu.memory_space<vmem>>, vector<1x32x16xbf16>
    %126 = vector.shape_cast %125 : vector<1x32x16xbf16> to vector<32x16xbf16>
    %127 = arith.truncf %124 : vector<16x32xf32> to vector<16x32xbf16>
    %cst_111 = arith.constant dense<0.000000e+00> : vector<32x32xf32>
    %128 = tpu.matmul %126, %127, %cst_111 {dimension_numbers = #tpu.dot_dimension_numbers<[1], [0], [0], [1], [0, 0, 1, 1], [], []>} : vector<32x16xbf16>, vector<16x32xbf16>, vector<32x32xf32> -> vector<32x32xf32>
    %129 = arith.addf %121, %128 : vector<32x32xf32>
    %c15 = arith.constant 15 : index
    %c0_112 = arith.constant 0 : index
    %c0_113 = arith.constant 0 : index
    %130 = vector.load %arg4[%c15, %c0_112, %c0_113] : memref<16x128x32xbf16, #tpu.memory_space<vmem>>, vector<1x128x32xbf16>
    %131 = vector.shape_cast %130 : vector<1x128x32xbf16> to vector<128x32xbf16>
    %cst_114 = arith.constant dense<0.000000e+00> : vector<16x32xf32>
    %132 = tpu.matmul %8, %131, %cst_114 {dimension_numbers = #tpu.dot_dimension_numbers<[1], [0], [0], [1], [0, 0, 1, 1], [], []>} : vector<16x128xbf16>, vector<128x32xbf16>, vector<16x32xf32> -> vector<16x32xf32>
    %c15_115 = arith.constant 15 : index
    %c0_116 = arith.constant 0 : index
    %c0_117 = arith.constant 0 : index
    %133 = vector.load %arg3[%c15_115, %c0_116, %c0_117] : memref<16x32x16xbf16, #tpu.memory_space<vmem>>, vector<1x32x16xbf16>
    %134 = vector.shape_cast %133 : vector<1x32x16xbf16> to vector<32x16xbf16>
    %135 = arith.truncf %132 : vector<16x32xf32> to vector<16x32xbf16>
    %cst_118 = arith.constant dense<0.000000e+00> : vector<32x32xf32>
    %136 = tpu.matmul %134, %135, %cst_118 {dimension_numbers = #tpu.dot_dimension_numbers<[1], [0], [0], [1], [0, 0, 1, 1], [], []>} : vector<32x16xbf16>, vector<16x32xbf16>, vector<32x32xf32> -> vector<32x32xf32>
    %137 = arith.addf %129, %136 : vector<32x32xf32>
    %cst_119 = arith.constant 0.000000e+00 : f32
    %138 = vector.broadcast %cst_119 : f32 to vector<32x32xf32>
    %139 = arith.cmpf ogt, %137, %138 : vector<32x32xf32>
    %cst_120 = arith.constant 2.000000e-01 : f32
    %140 = vector.broadcast %cst_120 : f32 to vector<32x32xf32>
    %141 = arith.mulf %140, %137 : vector<32x32xf32>
    %142 = arith.select %139, %137, %141 : vector<32x32xi1>, vector<32x32xf32>
    %c0_121 = arith.constant 0 : index
    %c0_122 = arith.constant 0 : index
    %143 = vector.load %arg5[%c0_121, %c0_122] : memref<32x32xf32, #tpu.memory_space<vmem>>, vector<32x32xf32>
    %144 = arith.mulf %142, %143 : vector<32x32xf32>
    %c0_123 = arith.constant 0 : index
    %c0_124 = arith.constant 0 : index
    %145 = vector.load %arg6[%c0_123, %c0_124] : memref<32x2xf32, #tpu.memory_space<vmem>>, vector<32x2xf32>
    %cst_125 = arith.constant dense<0.000000e+00> : vector<32x2xf32>
    %146 = tpu.matmul %144, %145, %cst_125 {dimension_numbers = #tpu.dot_dimension_numbers<[1], [0], [0], [1], [0, 0, 1, 1], [], []>} : vector<32x32xf32>, vector<32x2xf32>, vector<32x2xf32> -> vector<32x2xf32>
    %cst_126 = arith.constant dense<0.000000e+00> : vector<2xf32>
    %147 = vector.multi_reduction <add>, %146, %cst_126 [0] : vector<32x2xf32> to vector<2xf32>
    %148 = vector.shape_cast %147 : vector<2xf32> to vector<1x2xf32>
    %c0_127 = arith.constant 0 : index
    %c0_128 = arith.constant 0 : index
    %149 = vector.load %arg7[%c0_127, %c0_128] : memref<1x2xf32, #tpu.memory_space<vmem>>, vector<1x2xf32>
    tpu.vector_store %arg7[%c0_127, %c0_128], %148 {strides = array<i32>} : memref<1x2xf32, #tpu.memory_space<vmem>>, vector<1x2xf32>,
    return
  }
  func.func @transform_0(%arg0: i32) -> (i32, i32) {
    %c0_i32 = arith.constant 0 : i32
    %c0_i32_0 = arith.constant 0 : i32
    %c0_i32_1 = arith.constant 0 : i32
    return %c0_i32, %c0_i32_0 : i32, i32
  }
  func.func @transform_1(%arg0: i32) -> (i32, i32) {
    %c0_i32 = arith.constant 0 : i32
    %c0_i32_0 = arith.constant 0 : i32
    %c0_i32_1 = arith.constant 0 : i32
    return %c0_i32, %c0_i32_0 : i32, i32
  }
  func.func @transform_2(%arg0: i32) -> (i32, i32, i32) {
    %c0_i32 = arith.constant 0 : i32
    %c0_i32_0 = arith.constant 0 : i32
    %c0_i32_1 = arith.constant 0 : i32
    %c0_i32_2 = arith.constant 0 : i32
    return %c0_i32, %c0_i32_0, %c0_i32_1 : i32, i32, i32
  }
  func.func @transform_3(%arg0: i32) -> (i32, i32, i32) {
    %c0_i32 = arith.constant 0 : i32
    %c0_i32_0 = arith.constant 0 : i32
    %c0_i32_1 = arith.constant 0 : i32
    %c0_i32_2 = arith.constant 0 : i32
    return %c0_i32, %c0_i32_0, %c0_i32_1 : i32, i32, i32
  }
  func.func @transform_4(%arg0: i32) -> (i32, i32) {
    %c0_i32 = arith.constant 0 : i32
    %c0_i32_0 = arith.constant 0 : i32
    %c0_i32_1 = arith.constant 0 : i32
    return %c0_i32, %c0_i32_0 : i32, i32
  }
  func.func @transform_5(%arg0: i32) -> (i32, i32) {
    %c0_i32 = arith.constant 0 : i32
    %c0_i32_0 = arith.constant 0 : i32
    %c0_i32_1 = arith.constant 0 : i32
    return %c0_i32, %c0_i32_0 : i32, i32
  }
  func.func @transform_6(%arg0: i32) -> (i32, i32) {
    %c0_i32 = arith.constant 0 : i32
    %c0_i32_0 = arith.constant 0 : i32
    %c0_i32_1 = arith.constant 0 : i32
    return %c0_i32, %c0_i32_0 : i32, i32
  }
}

</mosaic_0001>

<bundles_post_ra>
// kernel: sngan_forward.3
= control target key start
LH: loop header
LB: loop body
LE: loop exit
PB: predicated region body
PF: predicated region fallthrough
CT: control target
= control target key end

     0   :  { %s779_s9 = smov 0   ;;  %s781_s10 = smov 0   ;;  %s920_s0 = inlined_call_operand.vmem [shape: bf16[4,48], index: 0, kind: input, shape index: {}]   ;;  %s921_s1 = inlined_call_operand.vmem [shape: bf16[48,2048], index: 1, kind: input, shape index: {}]   ;;  %s922_s2 = inlined_call_operand.vmem [shape: bf16[4,2048], index: 2, kind: output, shape index: {}]  }
   0x1   :  { %s783_s11 = smov 0  }
   0x2 LB: > { %s666_s12 = sadd.s32 4294967295, %s760_s11   ;;  %s796_s13 = sadd.s32 1, %s760_s11   ;;  %s760_s11 = sphi %s783_s11, %s925_s11   ;;  %s756_s10 = sphi %s781_s10, %s924_s10   ;;  %s752_s9 = sphi %s779_s9, %s923_s9  }
   0x3   : > { %s37_s14 = ssub.s32 %s760_s11, %s796_s13  ;;  %s40_s15 = sadd.s32 1, %s756_s10 }
   0x4   : > { %p38_p0 = scmp.eq.s32.totalorder %s37_s14, 0  ;;  %p47_p1 = scmp.ne.s32.totalorder %s756_s10, %s752_s9 }
   0x5   : > { %p48_p2 = scmp.eq.s32.totalorder %s760_s11, 0  ;;  %p669_p4 = scmp.ge.s32.totalorder %s760_s11, 2 }
   0x6   : > { %s805_s16 = scalar_select %p38_p0, %s756_s10, %s40_s15  }
   0x7   : > { %p49_p3 = por %p48_p2, %p47_p1  ;;  %102 = sbr.rel (%p669_p4) target bundleno = 31 (0x1f), region = 20 }
   0xe   : > { %105 = sbr.rel (!%p49_p3) target bundleno = 31 (0x1f), region = 24  ;;  %s107_s17 = sand.u32 (%p49_p3), 1, %s756_s10  }
   0xf   : > { %s709_s18 = sshll.u32 (%p49_p3), %s760_s11, 5  ;;  %s710_s19 = smul.u32 (%p49_p3), 192, %s107_s17 }
  0x10   : > { %s813_s22 = scalar_lea.vmem (%p49_p3), %s921_s1, %s709_s18 }
  0x11   : > { %v125_v0 = vld [vmem:[%s813_s22] sm:$0xff] (%p49_p3)  ;;  %v127_v1 = vld [vmem:[%s813_s22 + $0x8] sm:$0xff] (%p49_p3)  ;;  %v129_v2 = vld [vmem:[%s813_s22 + $0x10] sm:$0xff] (%p49_p3)  ;;  %s821_s23 = scalar_lea.vmem (%p49_p3), [#allocation2], %s710_s19 }
  0x12   : > { %v131_v3 = vld [vmem:[%s813_s22 + $0x18] sm:$0xff] (%p49_p3)  ;;  %v133_v4 = vld [vmem:[%s813_s22 + $0x40] sm:$0xff] (%p49_p3)  ;;  %v135_v5 = vld [vmem:[%s813_s22 + $0x48] sm:$0xff] (%p49_p3)  ;;  %126 = vst [vmem:[%s821_s23] sm:$0xff] (%p49_p3), %v125_v0 }
  0x13   : > { %128 = vst [vmem:[%s821_s23 + $0x8] sm:$0xff] (%p49_p3), %v127_v1  ;;  %130 = vst [vmem:[%s821_s23 + $0x10] sm:$0xff] (%p49_p3), %v129_v2  ;;  %v137_v6 = vld [vmem:[%s813_s22 + $0x50] sm:$0xff] (%p49_p3)  ;;  %v139_v7 = vld [vmem:[%s813_s22 + $0x58] sm:$0xff] (%p49_p3) }
  0x14   : > { %132 = vst [vmem:[%s821_s23 + $0x18] sm:$0xff] (%p49_p3), %v131_v3  ;;  %134 = vst [vmem:[%s821_s23 + $0x20] sm:$0xff] (%p49_p3), %v133_v4  ;;  %v141_v8 = vld [vmem:[%s813_s22 + $0x80] sm:$0xff] (%p49_p3)  ;;  %v143_v9 = vld [vmem:[%s813_s22 + $0x88] sm:$0xff] (%p49_p3) }
  0x15   : > { %136 = vst [vmem:[%s821_s23 + $0x28] sm:$0xff] %v135_v5  ;;  %138 = vst [vmem:[%s821_s23 + $0x30] sm:$0xff] %v137_v6  ;;  %v145_v10 = vld [vmem:[%s813_s22 + $0x90] sm:$0xff]  ;;  %v147_v11 = vld [vmem:[%s813_s22 + $0x98] sm:$0xff] }
  0x16   : > { %140 = vst [vmem:[%s821_s23 + $0x38] sm:$0xff] %v139_v7  ;;  %142 = vst [vmem:[%s821_s23 + $0x40] sm:$0xff] %v141_v8  ;;  %v149_v12 = vld [vmem:[%s813_s22 + $0xc0] sm:$0xff]  ;;  %v151_v13 = vld [vmem:[%s813_s22 + $0xc8] sm:$0xff] }
  0x17   : > { %144 = vst [vmem:[%s821_s23 + $0x48] sm:$0xff] %v143_v9  ;;  %146 = vst [vmem:[%s821_s23 + $0x50] sm:$0xff] %v145_v10  ;;  %v153_v14 = vld [vmem:[%s813_s22 + $0xd0] sm:$0xff]  ;;  %v155_v15 = vld [vmem:[%s813_s22 + $0xd8] sm:$0xff] }
  0x18   : > { %148 = vst [vmem:[%s821_s23 + $0x58] sm:$0xff] %v147_v11  ;;  %150 = vst [vmem:[%s821_s23 + $0x60] sm:$0xff] %v149_v12  ;;  %v157_v16 = vld [vmem:[%s813_s22 + $0x100] sm:$0xff]  ;;  %v159_v17 = vld [vmem:[%s813_s22 + $0x108] sm:$0xff] }
  0x19   : > { %152 = vst [vmem:[%s821_s23 + $0x68] sm:$0xff] %v151_v13  ;;  %154 = vst [vmem:[%s821_s23 + $0x70] sm:$0xff] %v153_v14  ;;  %v161_v18 = vld [vmem:[%s813_s22 + $0x110] sm:$0xff]  ;;  %v163_v19 = vld [vmem:[%s813_s22 + $0x118] sm:$0xff] }
  0x1a   : > { %156 = vst [vmem:[%s821_s23 + $0x78] sm:$0xff] %v155_v15  ;;  %158 = vst [vmem:[%s821_s23 + $0x80] sm:$0xff] %v157_v16  ;;  %v165_v20 = vld [vmem:[%s813_s22 + $0x140] sm:$0xff]  ;;  %v167_v21 = vld [vmem:[%s813_s22 + $0x148] sm:$0xff] }
  0x1b   : > { %160 = vst [vmem:[%s821_s23 + $0x88] sm:$0xff] %v159_v17  ;;  %162 = vst [vmem:[%s821_s23 + $0x90] sm:$0xff] %v161_v18  ;;  %v169_v22 = vld [vmem:[%s813_s22 + $0x150] sm:$0xff]  ;;  %v171_v23 = vld [vmem:[%s813_s22 + $0x158] sm:$0xff] }
  0x1c   : > { %164 = vst [vmem:[%s821_s23 + $0x98] sm:$0xff] %v163_v19  ;;  %166 = vst [vmem:[%s821_s23 + $0xa0] sm:$0xff] %v165_v20 }
  0x1d   : > { %168 = vst [vmem:[%s821_s23 + $0xa8] sm:$0xff] %v167_v21  ;;  %170 = vst [vmem:[%s821_s23 + $0xb0] sm:$0xff] %v169_v22 }
  0x1e   : > { %172 = vst [vmem:[%s821_s23 + $0xb8] sm:$0xff] %v171_v23 }
  0x1f PF: > { %p672_p5 = scmp.ge.s32.totalorder %s760_s11, 1  ;;  %p177_p6 = scmp.lt.s32.totalorder %s760_s11, 3 }
  0x21   : > { %p178_p7 = pnand %p672_p5, %p177_p6 }
  0x22   : > { %s184_s24 = sand.u32 (!%p178_p7), 1, %s752_s9   ;;  %v762_v24 = vmov (!%p178_p7), 0   ;;  %v213_v59 = vld [vmem:[%s920_s0] sm:$0x3] (!%p178_p7)  ;;  %vm358_vm0 = vcmask (!%p178_p7), 392192   ;;  %v571_v12 = vlaneseq (!%p178_p7)  ;;  %s673_s29 = sshll.u32 (!%p178_p7), %s666_s12, 3 }
  0x23   : > { %181 = sbr.rel (%p178_p7) target bundleno = 291 (0x123), region = 47  ;;  %394 = vmatprep.mubr.bf16.mxu0 (!%p178_p7), %v762_v24  ;;  %435 = vmatprep.mubr.bf16.mxu1 (!%p178_p7), %v762_v24  ;;  %v763_v10 = vmov (!%p178_p7), 1983009808   ;;  %p207_p8 = scmp.lt.s32.totalorder (!%p178_p7), %s673_s29, 15 }
  0x24   : > { %s711_s25 = smul.u32 (!%p178_p7), 192, %s184_s24  ;;  %v569_v11 = vunpack.c.l.s4 (!%p178_p7), %v763_v10  ;;  %v572_v14 = vshrl.u32 (!%p178_p7), %v571_v12, 7 }
  0x26   : > { %s870_s26 = scalar_lea.vmem (!%p178_p7), [#allocation2], %s711_s25  ;;  %v570_v13 = vunpack.c.0.s8 (!%p178_p7), %v569_v11 }
  0x27   : > { %v214_v25 = vld [vmem:[%s870_s26] sm:$0xff] (!%p178_p7)  ;;  %v215_v27 = vld [vmem:[%s870_s26 + $0x8] sm:$0xff] (!%p178_p7)  ;;  %v216_v47 = vld [vmem:[%s870_s26 + $0x10] sm:$0xff] (!%p178_p7) }
  0x28   : > { %v218_v26 = vld [vmem:[%s870_s26 + $0x20] sm:$0xff] (!%p178_p7)  ;;  %v219_v29 = vld [vmem:[%s870_s26 + $0x28] sm:$0xff] (!%p178_p7)  ;;  %v220_v48 = vld [vmem:[%s870_s26 + $0x30] sm:$0xff] (!%p178_p7)  ;;  %v573_v22 = vsub.s32 (!%p178_p7), %v570_v13, %v572_v14 }
  0x29   : > { %v676_v28 = vcombine.high (!%p178_p7), %v214_v25, %v218_v26  ;;  %v675_v30 = vcombine.low (!%p178_p7), %v214_v25, %v218_v26  ;;  %v222_v31 = vld [vmem:[%s870_s26 + $0x40] sm:$0xff] (!%p178_p7)  ;;  %v678_v33 = vcombine.high (!%p178_p7), %v215_v27, %v219_v29  ;;  %v677_v34 = vcombine.low (!%p178_p7), %v215_v27, %v219_v29  ;;  %v223_v36 = vld [vmem:[%s870_s26 + $0x48] sm:$0xff] (!%p178_p7)  ;;  %v217_v49 = vld [vmem:[%s870_s26 + $0x18] sm:$0xff] (!%p178_p7) }
  0x2a   : > { %v226_v32 = vld [vmem:[%s870_s26 + $0x60] sm:$0xff]  ;;  %v227_v37 = vld [vmem:[%s870_s26 + $0x68] sm:$0xff]  ;;  %v221_v50 = vld [vmem:[%s870_s26 + $0x38] sm:$0xff]  ;;  %v680_v53 = vcombine.high %v216_v47, %v220_v48  ;;  %v679_v60 = vcombine.low %v216_v47, %v220_v48  ;;  %s927_s29 = smov (!%p207_p8, %s673_s29), 15 }
  0x2b   : > { %v684_v35 = vcombine.high %v222_v31, %v226_v32  ;;  %v230_v38 = vld [vmem:[%s870_s26 + $0x80] sm:$0xff]  ;;  %362 = vmatprep.subr.bf16.mxu0 %v676_v28  ;;  %v686_v39 = vcombine.high %v223_v36, %v227_v37  ;;  %v231_v41 = vld [vmem:[%s870_s26 + $0x88] sm:$0xff]  ;;  %403 = vmatprep.subr.bf16.mxu1 %v678_v33  ;;  %v683_v43 = vcombine.low %v222_v31, %v226_v32  ;;  %v224_v55 = vld [vmem:[%s870_s26 + $0x50] sm:$0xff]  ;;  %s674_s30 = sshll.u32 %s927_s29, 1 }
  0x2c   : > { %v234_v40 = vld [vmem:[%s870_s26 + $0xa0] sm:$0xff]  ;;  %v235_v42 = vld [vmem:[%s870_s26 + $0xa8] sm:$0xff]  ;;  %363 = vmatpush1.bf16.msra.mxu0 %v675_v30  ;;  %404 = vmatpush1.bf16.msra.mxu1 %v677_v34  ;;  %v685_v44 = vcombine.low %v223_v36, %v227_v37  ;;  %v682_v54 = vcombine.high %v217_v49, %v221_v50  ;;  %v228_v56 = vld [vmem:[%s870_s26 + $0x70] sm:$0xff]  ;;  %v681_v61 = vcombine.low %v217_v49, %v221_v50  ;;  %s210_s5 = scalar_lea.vmem %s922_s2, %s674_s30 }
  0x2d   : > { %364 = vmatprep.subr.bf16.mxu0 %v684_v35  ;;  %v692_v45 = vcombine.high %v230_v38, %v234_v40  ;;  %405 = vmatprep.subr.bf16.mxu1 %v686_v39  ;;  %v694_v46 = vcombine.high %v231_v41, %v235_v42  ;;  %v691_v51 = vcombine.low %v230_v38, %v234_v40  ;;  %v225_v57 = vld [vmem:[%s870_s26 + $0x58] sm:$0xff]  ;;  %v232_v0 = vld [vmem:[%s870_s26 + $0x90] sm:$0xff] }
  0x2e   : > { %v693_v52 = vcombine.low %v231_v41, %v235_v42  ;;  %v229_v58 = vld [vmem:[%s870_s26 + $0x78] sm:$0xff]  ;;  %v688_v62 = vcombine.high %v224_v55, %v228_v56  ;;  %v236_v1 = vld [vmem:[%s870_s26 + $0xb0] sm:$0xff]  ;;  %v687_v4 = vcombine.low %v224_v55, %v228_v56 }
  0x2f   : > { %v690_v63 = vcombine.high %v225_v57, %v229_v58  ;;  %v233_v2 = vld [vmem:[%s870_s26 + $0x98] sm:$0xff]  ;;  %v689_v5 = vcombine.low %v225_v57, %v229_v58  ;;  %v696_v6 = vcombine.high %v232_v0, %v236_v1  ;;  %v695_v8 = vcombine.low %v232_v0, %v236_v1 }
  0x30   : > { %365 = vmatpush1.bf16.msra.mxu0 %v683_v43  ;;  %406 = vmatpush1.bf16.msra.mxu1 %v685_v44  ;;  %v237_v3 = vld [vmem:[%s870_s26 + $0xb8] sm:$0xff] }
  0x31   : > { %366 = vmatprep.subr.bf16.mxu0 %v692_v45  ;;  %407 = vmatprep.subr.bf16.mxu1 %v694_v46  ;;  %v698_v7 = vcombine.high %v233_v2, %v237_v3  ;;  %v697_v9 = vcombine.low %v233_v2, %v237_v3 }
  0x34   : > { %367 = vmatpush1.bf16.msra.mxu0 %v691_v51  ;;  %408 = vmatpush1.bf16.msra.mxu1 %v693_v52 }
  0x35   : > { %444 = vmatprep.subr.bf16.mxu0 %v680_v53  ;;  %485 = vmatprep.subr.bf16.mxu1 %v682_v54 }
  0x37   : > { %699 = vmatmul.mubr.msk.bf16.vlgmr.msra.gmra.mrb[0].mxu0 %vm358_vm0, %v213_v59  ;;  %700 = vmatmul.mubr.msk.bf16.vlgmr.msra.gmra.mrb[0].mxu1 %vm358_vm0, %v213_v59 }
  0x38   : > { %445 = vmatpush1.bf16.msra.mxu0 %v679_v60  ;;  %486 = vmatpush1.bf16.msra.mxu1 %v681_v61 }
  0x39   : > { %446 = vmatprep.subr.bf16.mxu0 %v688_v62  ;;  %487 = vmatprep.subr.bf16.mxu1 %v690_v63 }
  0x3a   : > { %476 = vmatprep.mubr.bf16.mxu0 %v762_v24  ;;  %517 = vmatprep.mubr.bf16.mxu1 %v762_v24 }
  0x3c   : > { %447 = vmatpush1.bf16.msra.mxu0 %v687_v4  ;;  %488 = vmatpush1.bf16.msra.mxu1 %v689_v5 }
  0x3d   : > { %448 = vmatprep.subr.bf16.mxu0 %v696_v6  ;;  %489 = vmatprep.subr.bf16.mxu1 %v698_v7 }
  0x40   : > { %449 = vmatpush1.bf16.msra.mxu0 %v695_v8  ;;  %490 = vmatpush1.bf16.msra.mxu1 %v697_v9 }
  0x43   : > { %701 = vmatmul.mubr.msk.bf16.vlgmr.msra.gmra.mrb[4].mxu0 %vm358_vm0, %v213_v59  ;;  %702 = vmatmul.mubr.msk.bf16.vlgmr.msra.gmra.mrb[4].mxu1 %vm358_vm0, %v213_v59 }
 0x10a   : > { %v396_v15 = vpop.f32.mrb[0].mxu0  ;;  %v437_v17 = vpop.f32.mrb[0].mxu1 }
 0x10b   : > { %vm526_vm1 = vcmp.gt.f32.partialorder %v396_v15, 0.0  ;;  %v534_v16 = vmul.f32 0.2, %v396_v15  ;;  %v398_v18 = vpop.f32.mrb[1].mxu0  ;;  %vm528_vm2 = vcmp.gt.f32.partialorder %v437_v17, 0.0  ;;  %v439_v23 = vpop.f32.mrb[1].mxu1 }
 0x10c   : > { %v536_v19 = vmul.f32 0.2, %v437_v17  ;;  %vm527_vm3 = vcmp.gt.f32.partialorder %v398_v18, 0.0  ;;  %v535_v20 = vmul.f32 0.2, %v398_v18  ;;  %v400_v24 = vpop.f32.mrb[2].mxu0 }
 0x10d   : > { %v542_v21 = vsel %vm526_vm1, %v396_v15, %v534_v16  ;;  %vm529_vm4 = vcmp.gt.f32.partialorder %v439_v23, 0.0  ;;  %v537_v27 = vmul.f32 0.2, %v439_v23  ;;  %v441_v28 = vpop.f32.mrb[2].mxu1  ;;  %v401_v29 = vpop.f32.mrb[3].mxu0 }
 0x10e   : > { %v544_v25 = vsel %vm528_vm2, %v437_v17, %v536_v19  ;;  %v543_v26 = vsel %vm527_vm3, %v398_v18, %v535_v20  ;;  %v442_v31 = vpop.f32.mrb[3].mxu1 }
 0x10f   : > { %v703_v30 = vpack.c.bf16 %v543_v26, %v542_v21  ;;  %v545_v32 = vsel %vm529_vm4, %v439_v23, %v537_v27 }
 0x110   : > { %v704_v34 = vpack.c.bf16 %v545_v32, %v544_v25 }
 0x111   : > { %v574_v33 = vrot.slane %v703_v30, %v573_v22 }
 0x112   : > { %v581_v35 = vrot.slane %v704_v34, %v573_v22 }
 0x114   : > { %v582_v36 = vcombine.low %v574_v33, %v581_v35 }
 0x116   : > { %v478_v37 = vpop.f32.mrb[4].mxu0  ;;  %602 = vst [vmem:[%s210_s5] sm:$0xff] %v582_v36  ;;  %v519_v39 = vpop.f32.mrb[4].mxu1 }
 0x117   : > { %vm530_vm5 = vcmp.gt.f32.partialorder %v478_v37, 0.0  ;;  %v538_v38 = vmul.f32 0.2, %v478_v37  ;;  %v480_v40 = vpop.f32.mrb[5].mxu0  ;;  %vm532_vm6 = vcmp.gt.f32.partialorder %v519_v39, 0.0  ;;  %v521_v44 = vpop.f32.mrb[5].mxu1 }
 0x118   : > { %v540_v41 = vmul.f32 0.2, %v519_v39  ;;  %vm531_vm7 = vcmp.gt.f32.partialorder %v480_v40, 0.0  ;;  %v539_v42 = vmul.f32 0.2, %v480_v40  ;;  %v482_v45 = vpop.f32.mrb[6].mxu0 }
 0x119   : > { %v546_v43 = vsel %vm530_vm5, %v478_v37, %v538_v38  ;;  %vm533_vm8 = vcmp.gt.f32.partialorder %v521_v44, 0.0  ;;  %v541_v48 = vmul.f32 0.2, %v521_v44  ;;  %v523_v49 = vpop.f32.mrb[6].mxu1  ;;  %v483_v50 = vpop.f32.mrb[7].mxu0 }
 0x11a   : > { %v548_v46 = vsel %vm532_vm6, %v519_v39, %v540_v41  ;;  %v547_v47 = vsel %vm531_vm7, %v480_v40, %v539_v42  ;;  %v524_v52 = vpop.f32.mrb[7].mxu1 }
 0x11b   : > { %v705_v51 = vpack.c.bf16 %v547_v47, %v546_v43  ;;  %v549_v53 = vsel %vm533_vm8, %v521_v44, %v541_v48 }
 0x11c   : > { %v706_v55 = vpack.c.bf16 %v549_v53, %v548_v46 }
 0x11d   : > { %v591_v54 = vrot.slane %v705_v51, %v573_v22 }
 0x11e   : > { %v598_v56 = vrot.slane %v706_v55, %v573_v22 }
 0x120   : > { %v599_v57 = vcombine.low %v591_v54, %v598_v56 }
 0x122   : > { %603 = vst [vmem:[%s210_s5 + $0x8] sm:$0xff] %v599_v57 }
 0x123 PF: > { %p9_p9 = scmp.ge.s32.totalorder %s796_s13, 4   ;;  %s923_s9 = smov %s756_s10 }
 0x124   : > { %s924_s10 = smov %s805_s16  ;;  %s925_s11 = smov %s796_s13 }
 0x125   :  { %11 = sbr.rel (!%p9_p9) target bundleno = 2 (0x2), region = 86 }

// kernel: sngan_forward.4
= control target key start
LH: loop header
LB: loop body
LE: loop exit
PB: predicated region body
PF: predicated region fallthrough
CT: control target
= control target key end

     0   :  { %s483_s9 = smov 0   ;;  %s485_s10 = smov 0   ;;  %s538_s0 = inlined_call_operand.vmem [shape: bf16[8,64], index: 0, kind: input, shape index: {}]   ;;  %s539_s1 = inlined_call_operand.vmem [shape: bf16[64,512], index: 1, kind: input, shape index: {}]   ;;  %s540_s2 = inlined_call_operand.vmem [shape: bf16[8,512], index: 2, kind: output, shape index: {}]  }
   0x1   :  { %s487_s11 = smov 0  }
   0x2 LB: > { %s381_s12 = sadd.s32 4294967295, %s465_s11   ;;  %s500_s13 = sadd.s32 1, %s465_s11   ;;  %s465_s11 = sphi %s487_s11, %s543_s11   ;;  %s461_s10 = sphi %s485_s10, %s542_s10   ;;  %s457_s9 = sphi %s483_s9, %s541_s9  }
   0x3   : > { %s37_s14 = ssub.s32 %s465_s11, %s500_s13  ;;  %s40_s15 = sadd.s32 1, %s461_s10 }
   0x4   : > { %p38_p0 = scmp.eq.s32.totalorder %s37_s14, 0  ;;  %p47_p1 = scmp.ne.s32.totalorder %s461_s10, %s457_s9 }
   0x5   : > { %p48_p2 = scmp.eq.s32.totalorder %s465_s11, 0  ;;  %p384_p4 = scmp.ge.s32.totalorder %s465_s11, 2 }
   0x6   : > { %s509_s16 = scalar_select %p38_p0, %s461_s10, %s40_s15  }
   0x7   : > { %p49_p3 = por %p48_p2, %p47_p1  ;;  %102 = sbr.rel (%p384_p4) target bundleno = 22 (0x16), region = 20 }
   0xe   : > { %105 = sbr.rel (!%p49_p3) target bundleno = 22 (0x16), region = 24  ;;  %s107_s17 = sand.u32 (%p49_p3), 1, %s461_s10  }
   0xf   : > { %s404_s18 = sshll.u32 (%p49_p3), %s465_s11, 3  ;;  %s385_s19 = sshll.u32 (%p49_p3), %s107_s17, 6 }
  0x10   : > { %s112_s22 = scalar_lea.vmem (%p49_p3), %s539_s1, %s404_s18  ;;  %s109_s23 = scalar_lea.vmem (%p49_p3), [#allocation2], %s385_s19 }
  0x11   : > { %v154_v0 = vld [vmem:[%s112_s22] sm:$0xff] (%p49_p3)  ;;  %v156_v1 = vld [vmem:[%s112_s22 + $0x10] sm:$0xff] (%p49_p3) }
  0x12   : > { %v158_v2 = vld [vmem:[%s112_s22 + $0x20] sm:$0xff] (%p49_p3)  ;;  %155 = vst [vmem:[%s109_s23] sm:$0xff] (%p49_p3), %v154_v0  ;;  %157 = vst [vmem:[%s109_s23 + $0x8] sm:$0xff] (%p49_p3), %v156_v1  ;;  %v160_v3 = vld [vmem:[%s112_s22 + $0x30] sm:$0xff] (%p49_p3) }
  0x13   : > { %159 = vst [vmem:[%s109_s23 + $0x10] sm:$0xff] (%p49_p3), %v158_v2  ;;  %v162_v4 = vld [vmem:[%s112_s22 + $0x40] sm:$0xff] (%p49_p3)  ;;  %v164_v5 = vld [vmem:[%s112_s22 + $0x50] sm:$0xff] (%p49_p3)  ;;  %161 = vst [vmem:[%s109_s23 + $0x18] sm:$0xff] (%p49_p3), %v160_v3 }
  0x14   : > { %163 = vst [vmem:[%s109_s23 + $0x20] sm:$0xff] (%p49_p3), %v162_v4  ;;  %165 = vst [vmem:[%s109_s23 + $0x28] sm:$0xff] (%p49_p3), %v164_v5  ;;  %v166_v6 = vld [vmem:[%s112_s22 + $0x60] sm:$0xff] (%p49_p3)  ;;  %v168_v7 = vld [vmem:[%s112_s22 + $0x70] sm:$0xff] (%p49_p3) }
  0x15   : > { %167 = vst [vmem:[%s109_s23 + $0x30] sm:$0xff] %v166_v6  ;;  %169 = vst [vmem:[%s109_s23 + $0x38] sm:$0xff] %v168_v7 }
  0x16 PF: > { %p388_p5 = scmp.ge.s32.totalorder %s465_s11, 1  ;;  %p174_p6 = scmp.lt.s32.totalorder %s465_s11, 3 }
  0x18   : > { %p175_p7 = pnand %p388_p5, %p174_p6 }
  0x19   : > { %s181_s24 = sand.u32 (!%p175_p7), 1, %s457_s9   ;;  %v467_v8 = vmov (!%p175_p7), 0   ;;  %v210_v17 = vld [vmem:[%s538_s0] sm:$0xf] (!%p175_p7)  ;;  %vm259_vm0 = vcmask (!%p175_p7), 523264   ;;  %s390_s29 = sshll.u32 (!%p175_p7), %s381_s12, 1 }
  0x1a   : > { %178 = sbr.rel (%p175_p7) target bundleno = 264 (0x108), region = 62  ;;  %s389_s25 = sshll.u32 (!%p175_p7), %s181_s24, 6  ;;  %295 = vmatprep.mubr.bf16.mxu0 (!%p175_p7), %v467_v8 }
  0x1b   : > { %s183_s26 = scalar_lea.vmem (!%p175_p7), [#allocation2], %s389_s25  ;;  %p204_p8 = scmp.lt.s32.totalorder (!%p175_p7), %s390_s29, 3 }
  0x1c   : > { %v431_v9 = vld [vmem:[%s183_s26 + $0x4] ss:$8 sps:$4 sm:$0xff] (!%p175_p7)   ;;  %v433_v10 = vld [vmem:[%s183_s26] ss:$8 sps:$4 sm:$0xff] (!%p175_p7)   ;;  %v434_v11 = vld [vmem:[%s183_s26 + $0x14] ss:$8 sps:$4 sm:$0xff] (!%p175_p7)  }
  0x1d   : > { %263 = vmatprep.subr.bf16.mxu0 (!%p175_p7), %v431_v9  ;;  %v436_v12 = vld [vmem:[%s183_s26 + $0x10] ss:$8 sps:$4 sm:$0xff] (!%p175_p7)   ;;  %v437_v13 = vld [vmem:[%s183_s26 + $0x24] ss:$8 sps:$4 sm:$0xff] (!%p175_p7)   ;;  %v439_v14 = vld [vmem:[%s183_s26 + $0x20] ss:$8 sps:$4 sm:$0xff] (!%p175_p7)  }
  0x1e   : > { %264 = vmatpush1.bf16.msra.mxu0 (!%p175_p7), %v433_v10  ;;  %v440_v15 = vld [vmem:[%s183_s26 + $0x34] ss:$8 sps:$4 sm:$0xff] (!%p175_p7)   ;;  %v442_v16 = vld [vmem:[%s183_s26 + $0x30] ss:$8 sps:$4 sm:$0xff] (!%p175_p7)  }
  0x1f   : > { %265 = vmatprep.subr.bf16.mxu0 (!%p175_p7), %v434_v11 }
  0x21   : > { %s545_s29 = smov (!%p204_p8, %s390_s29), 3 }
  0x22   : > { %266 = vmatpush1.bf16.msra.mxu0 %v436_v12  ;;  %s391_s30 = sshll.u32 %s545_s29, 2 }
  0x23   : > { %267 = vmatprep.subr.bf16.mxu0 %v437_v13  ;;  %s207_s5 = scalar_lea.vmem %s540_s2, %s391_s30 }
  0x26   : > { %268 = vmatpush1.bf16.msra.mxu0 %v439_v14 }
  0x27   : > { %269 = vmatprep.subr.bf16.mxu0 %v440_v15 }
  0x2a   : > { %270 = vmatpush1.bf16.msra.mxu0 %v442_v16 }
  0x2d   : > { %400 = vmatmul.mubr.msk.bf16.vlgmr.msra.gmra.mrb[0].mxu0 %vm259_vm0, %v210_v17 }
 0x100   : > { %v297_v18 = vpop.f32.mrb[0].mxu0 }
 0x101   : > { %vm304_vm1 = vcmp.gt.f32.partialorder %v297_v18, 0.0  ;;  %v306_v19 = vmul.f32 0.2, %v297_v18  ;;  %v299_v20 = vpop.f32.mrb[1].mxu0 }
 0x102   : > { %vm305_vm2 = vcmp.gt.f32.partialorder %v299_v20, 0.0  ;;  %v307_v21 = vmul.f32 0.2, %v299_v20  ;;  %v301_v22 = vpop.f32.mrb[2].mxu0 }
 0x103   : > { %v308_v23 = vsel %vm304_vm1, %v297_v18, %v306_v19  ;;  %v302_v24 = vpop.f32.mrb[3].mxu0 }
 0x104   : > { %v309_v25 = vsel %vm305_vm2, %v299_v20, %v307_v21 }
 0x105   : > { %v405_v26 = vpack.c.bf16 %v309_v25, %v308_v23 }
 0x107   : > { %318 = vst [vmem:[%s207_s5] sm:$0xff] %v405_v26 }
 0x108 PF: > { %p9_p9 = scmp.ge.s32.totalorder %s500_s13, 4   ;;  %s541_s9 = smov %s461_s10 }
 0x109   : > { %s542_s10 = smov %s509_s16  ;;  %s543_s11 = smov %s500_s13 }
 0x10a   :  { %11 = sbr.rel (!%p9_p9) target bundleno = 2 (0x2), region = 101 }

// kernel: sngan_forward.5
= control target key start
LH: loop header
LB: loop body
LE: loop exit
PB: predicated region body
PF: predicated region fallthrough
CT: control target
= control target key end

     0   :  { %v4612_v1 = vmov 0.0   ;;  %vm4613_vm0 = vmmov 0   ;;  %s5449_s0 = inlined_call_operand.vmem [shape: bf16[128,128], index: 0, kind: input, shape index: {}]   ;;  %s5450_s1 = inlined_call_operand.vmem [shape: bf16[16,128], index: 1, kind: input, shape index: {}]   ;;  %s5451_s2 = inlined_call_operand.vmem [shape: bf16[16,32,16], index: 2, kind: input, shape index: {}]   ;;  %s5452_s3 = inlined_call_operand.vmem [shape: bf16[16,128,32], index: 3, kind: input, shape index: {}]   ;;  %s5453_s4 = inlined_call_operand.vmem [shape: f32[32,32], index: 4, kind: input, shape index: {}]   ;;  %s5454_s5 = inlined_call_operand.vmem [shape: f32[32,2], index: 5, kind: input, shape index: {}]   ;;  %s5455_s6 = inlined_call_operand.hbm [shape: f32[1,2], index: 6, kind: output, shape index: {}]  }
   0x1   :  { %v4419_v0 = vld [vmem:[%s5449_s0] sm:$0xff]   ;;  %3898 = vmatprep.subr.bf16.mxu0 %v4612_v1  ;;  %3918 = vmatprep.subr.bf16.mxu1 %v4612_v1  ;;  %v4420_v2 = vld [vmem:[%s5449_s0 + $0x8] sm:$0xff]   ;;  %v4421_v3 = vld [vmem:[%s5449_s0 + $0x10] sm:$0xff]  }
   0x2   :  { %3899 = vmatpush3.bf16.msra.mxu0 %v4419_v0  ;;  %3914 = vmatprep.mubr.msk.bf16.mxu0 %vm4613_vm0, %v4612_v1  ;;  %v4428_v4 = vld [vmem:[%s5452_s3] sm:$0xff]   ;;  %v4422_v5 = vld [vmem:[%s5449_s0 + $0x18] sm:$0xff]   ;;  %v4430_v6 = vld [vmem:[%s5452_s3 + $0x8] sm:$0xff]  }
   0x3   :  { %3900 = vmatprep.subr.bf16.mxu0 %v4612_v1  ;;  %3934 = vmatprep.mubr.msk.bf16.mxu1 %vm4613_vm0, %v4612_v1  ;;  %v4423_v7 = vld [vmem:[%s5449_s0 + $0x20] sm:$0xff]   ;;  %v4432_v8 = vld [vmem:[%s5452_s3 + $0x10] sm:$0xff]   ;;  %v4424_v9 = vld [vmem:[%s5449_s0 + $0x28] sm:$0xff]  }
   0x4   :  { %3919 = vmatpush3.bf16.msra.mxu1 %v4428_v4  ;;  %v4434_v10 = vld [vmem:[%s5452_s3 + $0x18] sm:$0xff]   ;;  %v4425_v11 = vld [vmem:[%s5449_s0 + $0x30] sm:$0xff]   ;;  %v4436_v12 = vld [vmem:[%s5452_s3 + $0x20] sm:$0xff]  }
   0x5   :  { %3920 = vmatprep.subr.bf16.mxu1 %v4612_v1  ;;  %v4426_v13 = vld [vmem:[%s5449_s0 + $0x38] sm:$0xff]   ;;  %v4438_v14 = vld [vmem:[%s5452_s3 + $0x28] sm:$0xff]   ;;  %v4427_v15 = vld [vmem:[%s5450_s1] sm:$0xff]  }
   0x6   :  { %3901 = vmatpush3.bf16.msra.mxu0 %v4420_v2  ;;  %v4429_v16 = vld [vmem:[%s5452_s3 + $0x40] sm:$0xff]   ;;  %v4431_v17 = vld [vmem:[%s5452_s3 + $0x48] sm:$0xff]   ;;  %v4433_v18 = vld [vmem:[%s5452_s3 + $0x50] sm:$0xff]  }
   0x7   :  { %3902 = vmatprep.subr.bf16.mxu0 %v4612_v1  ;;  %v4435_v19 = vld [vmem:[%s5452_s3 + $0x58] sm:$0xff]   ;;  %v4437_v20 = vld [vmem:[%s5452_s3 + $0x60] sm:$0xff]   ;;  %v4439_v21 = vld [vmem:[%s5452_s3 + $0x68] sm:$0xff]  }
   0x8   :  { %3921 = vmatpush3.bf16.msra.mxu1 %v4430_v6  ;;  %v4440_v22 = vld [vmem:[%s5452_s3 + $0x30] sm:$0xff]   ;;  %v4442_v24 = vld [vmem:[%s5452_s3 + $0x38] sm:$0xff]  }
   0x9   :  { %3922 = vmatprep.subr.bf16.mxu1 %v4612_v1  ;;  %v4441_v23 = vld [vmem:[%s5452_s3 + $0x70] sm:$0xff]   ;;  %v4443_v25 = vld [vmem:[%s5452_s3 + $0x78] sm:$0xff]  }
   0xa   :  { %3903 = vmatpush3.bf16.msra.mxu0 %v4421_v3 }
   0xb   :  { %3904 = vmatprep.subr.bf16.mxu0 %v4612_v1 }
   0xc   :  { %3923 = vmatpush3.bf16.msra.mxu1 %v4432_v8 }
   0xd   :  { %3924 = vmatprep.subr.bf16.mxu1 %v4612_v1 }
   0xe   :  { %3905 = vmatpush3.bf16.msra.mxu0 %v4422_v5 }
   0xf   :  { %3906 = vmatprep.subr.bf16.mxu0 %v4612_v1 }
  0x10   :  { %3925 = vmatpush3.bf16.msra.mxu1 %v4434_v10 }
  0x11   :  { %3926 = vmatprep.subr.bf16.mxu1 %v4612_v1 }
  0x12   :  { %3907 = vmatpush3.bf16.msra.mxu0 %v4423_v7 }
  0x13   :  { %3908 = vmatprep.subr.bf16.mxu0 %v4612_v1 }
  0x14   :  { %3927 = vmatpush3.bf16.msra.mxu1 %v4436_v12 }
  0x15   :  { %3928 = vmatprep.subr.bf16.mxu1 %v4612_v1 }
  0x16   :  { %3909 = vmatpush3.bf16.msra.mxu0 %v4424_v9 }
  0x17   :  { %3910 = vmatprep.subr.bf16.mxu0 %v4612_v1 }
  0x18   :  { %3929 = vmatpush3.bf16.msra.mxu1 %v4438_v14 }
  0x19   :  { %3930 = vmatprep.subr.bf16.mxu1 %v4612_v1 }
  0x1a   :  { %3911 = vmatpush3.bf16.msra.mxu0 %v4425_v11 }
  0x1b   :  { %3912 = vmatprep.subr.bf16.mxu0 %v4612_v1 }
  0x1c   :  { %3931 = vmatpush3.bf16.msra.mxu1 %v4440_v22 }
  0x1d   :  { %3932 = vmatprep.subr.bf16.mxu1 %v4612_v1 }
  0x1e   :  { %3913 = vmatpush3.bf16.msra.mxu0 %v4426_v13 }
  0x1f   :  { %3938 = vmatprep.subr.bf16.mxu0 %v4612_v1 }
  0x20   :  { %3933 = vmatpush3.bf16.msra.mxu1 %v4442_v24 }
  0x21   :  { %3915 = vmatmul.mubr.bf16.vlgmr.msra.gmra.mrb[0].mxu0 %v4427_v15 }
  0x22   :  { %3939 = vmatpush3.bf16.msra.mxu0 %v4429_v16  ;;  %3954 = vmatprep.mubr.msk.bf16.mxu0 %vm4613_vm0, %v4612_v1 }
  0x23   :  { %3940 = vmatprep.subr.bf16.mxu0 %v4612_v1 }
  0x26   :  { %3941 = vmatpush3.bf16.msra.mxu0 %v4431_v17 }
  0x27   :  { %3942 = vmatprep.subr.bf16.mxu0 %v4612_v1 }
  0x2a   :  { %3943 = vmatpush3.bf16.msra.mxu0 %v4433_v18 }
  0x2b   :  { %3944 = vmatprep.subr.bf16.mxu0 %v4612_v1 }
  0x2e   :  { %3945 = vmatpush3.bf16.msra.mxu0 %v4435_v19 }
  0x2f   :  { %3946 = vmatprep.subr.bf16.mxu0 %v4612_v1 }
  0x32   :  { %3947 = vmatpush3.bf16.msra.mxu0 %v4437_v20 }
  0x33   :  { %3948 = vmatprep.subr.bf16.mxu0 %v4612_v1 }
  0x36   :  { %3949 = vmatpush3.bf16.msra.mxu0 %v4439_v21 }
  0x37   :  { %3950 = vmatprep.subr.bf16.mxu0 %v4612_v1 }
  0x3a   :  { %3951 = vmatpush3.bf16.msra.mxu0 %v4441_v23 }
  0x3b   :  { %3952 = vmatprep.subr.bf16.mxu0 %v4612_v1 }
  0x3e   :  { %3953 = vmatpush3.bf16.msra.mxu0 %v4443_v25 }
  0x3f   :  { %11 = vsyncpa [#allocation3], 0  ;;  %v4444_v35 = vld [vmem:[%s5451_s2 + $0x10] sm:$0xff]   ;;  %vm377_vm3 = vcmask 130048   ;;  %v4446_v36 = vld [vmem:[%s5451_s2] sm:$0xff]   ;;  %vm3056_vm6 = vcmask 261120  }
  0x40   :  { %v4445_v47 = vld [vmem:[%s5451_s2 + $0x18] sm:$0xff]   ;;  %v4447_v48 = vld [vmem:[%s5451_s2 + $0x8] sm:$0xff]   ;;  %v4448_v49 = vld [vmem:[%s5452_s3 + $0x80] sm:$0xff]   ;;  %vm3154_vm9 = vcmask 15360   ;;  %vm3168_vm10 = vcmask 8192  }
  0x41   :  { %v4449_v50 = vld [vmem:[%s5452_s3 + $0xc0] sm:$0xff]   ;;  %v4450_v51 = vld [vmem:[%s5452_s3 + $0x88] sm:$0xff]   ;;  %v4452_v53 = vld [vmem:[%s5452_s3 + $0x90] sm:$0xff]  }
  0x42   :  { %v4451_v52 = vld [vmem:[%s5452_s3 + $0xc8] sm:$0xff]   ;;  %v4453_v54 = vld [vmem:[%s5452_s3 + $0xd0] sm:$0xff]   ;;  %v4454_v55 = vld [vmem:[%s5452_s3 + $0x98] sm:$0xff]  }
  0x43   :  { %v4455_v56 = vld [vmem:[%s5452_s3 + $0xd8] sm:$0xff]   ;;  %v4456_v57 = vld [vmem:[%s5452_s3 + $0xa0] sm:$0xff]   ;;  %v4458_v59 = vld [vmem:[%s5452_s3 + $0xa8] sm:$0xff]  }
  0x44   :  { %v4457_v58 = vld [vmem:[%s5452_s3 + $0xe0] sm:$0xff]   ;;  %v4459_v60 = vld [vmem:[%s5452_s3 + $0xe8] sm:$0xff]   ;;  %v4460_v61 = vld [vmem:[%s5452_s3 + $0xb0] sm:$0xff]  }
  0x45   :  { %v4461_v62 = vld [vmem:[%s5452_s3 + $0xf0] sm:$0xff]   ;;  %v4462_v63 = vld [vmem:[%s5452_s3 + $0xb8] sm:$0xff]   ;;  %v4464_v2 = vld [vmem:[%s5452_s3 + $0x100] sm:$0xff]  }
  0x46   :  { %v4463_v0 = vld [vmem:[%s5452_s3 + $0xf8] sm:$0xff]   ;;  %v4465_v3 = vld [vmem:[%s5452_s3 + $0x108] sm:$0xff]   ;;  %v4466_v4 = vld [vmem:[%s5452_s3 + $0x110] sm:$0xff]  }
  0x47   :  { %v4467_v5 = vld [vmem:[%s5452_s3 + $0x118] sm:$0xff]   ;;  %v4468_v6 = vld [vmem:[%s5452_s3 + $0x120] sm:$0xff]   ;;  %v4469_v7 = vld [vmem:[%s5452_s3 + $0x128] sm:$0xff]  }
  0x48   :  { %v4470_v8 = vld [vmem:[%s5452_s3 + $0x130] sm:$0xff]   ;;  %v4471_v9 = vld [vmem:[%s5452_s3 + $0x138] sm:$0xff]   ;;  %v4472_v10 = vld [vmem:[%s5452_s3 + $0x180] sm:$0xff]  }
  0x49   :  { %v4473_v11 = vld [vmem:[%s5452_s3 + $0x188] sm:$0xff]   ;;  %v4474_v12 = vld [vmem:[%s5452_s3 + $0x190] sm:$0xff]   ;;  %v4475_v13 = vld [vmem:[%s5452_s3 + $0x198] sm:$0xff]  }
  0x4a   :  { %v4476_v14 = vld [vmem:[%s5452_s3 + $0x1a0] sm:$0xff]   ;;  %v4477_v15 = vld [vmem:[%s5452_s3 + $0x1a8] sm:$0xff]   ;;  %v4478_v16 = vld [vmem:[%s5452_s3 + $0x1b0] sm:$0xff]  }
  0x4b   :  { %v4479_v17 = vld [vmem:[%s5452_s3 + $0x1b8] sm:$0xff]   ;;  %v4480_v18 = vld [vmem:[%s5452_s3 + $0x200] sm:$0xff]   ;;  %v4481_v19 = vld [vmem:[%s5452_s3 + $0x208] sm:$0xff]  }
  0x4c   :  { %v4482_v20 = vld [vmem:[%s5452_s3 + $0x210] sm:$0xff]   ;;  %v4483_v21 = vld [vmem:[%s5452_s3 + $0x218] sm:$0xff]   ;;  %v4484_v22 = vld [vmem:[%s5452_s3 + $0x220] sm:$0xff]  }
  0x4d   :  { %v4485_v23 = vld [vmem:[%s5452_s3 + $0x228] sm:$0xff]   ;;  %v4486_v24 = vld [vmem:[%s5452_s3 + $0x230] sm:$0xff]   ;;  %v4487_v25 = vld [vmem:[%s5452_s3 + $0x238] sm:$0xff]  }
  0xf4   :  { %v131_v26 = vpop.f32.mrb[0].mxu0 }
  0xf5   :  { %v140_v27 = vmul.f32 0.2, %v131_v26  ;;  %v3916_v28 = vpop.f32.mrb[1].mxu0  ;;  %vm138_vm1 = vcmp.gt.f32.partialorder %v131_v26, 0.0 }
  0xf6   :  { %v134_v29 = vpop.f32.mrb[2].mxu0  ;;  %v4489_v28 = vld [vmem:[%s5452_s3 + $0x248] sm:$0xff]  }
  0xf7   :  { %vm139_vm2 = vcmp.gt.f32.partialorder %v134_v29, 0.0  ;;  %v141_v30 = vmul.f32 0.2, %v134_v29  ;;  %v3917_v31 = vpop.f32.mrb[3].mxu0  ;;  %v142_v32 = vsel %vm138_vm1, %v131_v26, %v140_v27  ;;  %v4519_v26 = vld [vmem:[%s5451_s2 + $0x20] sm:$0xff]  }
  0xf8   :  { %v4488_v27 = vld [vmem:[%s5452_s3 + $0x240] sm:$0xff]  }
  0xf9   :  { %v143_v33 = vsel %vm139_vm2, %v134_v29, %v141_v30  ;;  %v4490_v29 = vld [vmem:[%s5452_s3 + $0x250] sm:$0xff]   ;;  %v4491_v30 = vld [vmem:[%s5452_s3 + $0x258] sm:$0xff]   ;;  %v4492_v31 = vld [vmem:[%s5452_s3 + $0x260] sm:$0xff]  }
  0xfa   :  { %v4755_v34 = vpack.c.bf16 %v143_v33, %v142_v32  ;;  %v4493_v32 = vld [vmem:[%s5452_s3 + $0x268] sm:$0xff]   ;;  %v4494_v33 = vld [vmem:[%s5452_s3 + $0x270] sm:$0xff]  }
  0xfc   :  { %3935 = vmatmul.mubr.bf16.vlgmr.msra.gmra.mrb[0].mxu1 %v4755_v34  ;;  %3955 = vmatmul.mubr.bf16.vlgmr.msra.gmra.mrb[4].mxu0 %v4755_v34 }
  0xfd   :  { %3960 = vmatprep.mubr.msk.bf16.mxu0 %vm377_vm3, %v4444_v35  ;;  %3966 = vmatprep.mubr.msk.bf16.mxu1 %vm377_vm3, %v4446_v36  ;;  %v4495_v35 = vld [vmem:[%s5452_s3 + $0x278] sm:$0xff]   ;;  %v4496_v36 = vld [vmem:[%s5452_s3 + $0x2c0] sm:$0xff]  }
 0x1cf   :  { %v243_v37 = vpop.f32.mrb[0].mxu1  ;;  %v354_v38 = vpop.f32.mrb[4].mxu0 }
 0x1d0   :  { %v3936_v39 = vpop.f32.mrb[1].mxu1  ;;  %v3956_v40 = vpop.f32.mrb[5].mxu0 }
 0x1d1   :  { %v246_v41 = vpop.f32.mrb[2].mxu1  ;;  %v357_v42 = vpop.f32.mrb[6].mxu0  ;;  %v4499_v39 = vld [vmem:[%s5452_s3 + $0x2d8] sm:$0xff]   ;;  %v4500_v40 = vld [vmem:[%s5452_s3 + $0x2e0] sm:$0xff]  }
 0x1d2   :  { %v254_v43 = vpack.c.bf16 %v246_v41, %v243_v37  ;;  %v366_v44 = vpack.c.bf16 %v357_v42, %v354_v38  ;;  %v3937_v45 = vpop.f32.mrb[3].mxu1  ;;  %v3957_v46 = vpop.f32.mrb[7].mxu0  ;;  %v4497_v37 = vld [vmem:[%s5452_s3 + $0x2c8] sm:$0xff]   ;;  %v4498_v38 = vld [vmem:[%s5452_s3 + $0x2d0] sm:$0xff]  }
 0x1d3   :  { %v4501_v41 = vld [vmem:[%s5452_s3 + $0x2e8] sm:$0xff]   ;;  %v4502_v42 = vld [vmem:[%s5452_s3 + $0x2f0] sm:$0xff]  }
 0x1d4   :  { %3958 = vmatprep.subr.bf16.mxu0 %v366_v44  ;;  %3964 = vmatprep.subr.bf16.mxu1 %v254_v43  ;;  %v4505_v45 = vld [vmem:[%s5452_s3 + $0x308] sm:$0xff]   ;;  %v4506_v46 = vld [vmem:[%s5452_s3 + $0x310] sm:$0xff]  }
 0x1d5   :  { %3959 = vmatpush3.bf16.msra.mxu0 %v366_v44  ;;  %3965 = vmatpush3.bf16.msra.mxu1 %v254_v43  ;;  %v4503_v43 = vld [vmem:[%s5452_s3 + $0x2f8] sm:$0xff]   ;;  %v4504_v44 = vld [vmem:[%s5452_s3 + $0x300] sm:$0xff]  }
 0x1d6   :  { %3970 = vmatprep.subr.bf16.mxu1 %v4612_v1  ;;  %3996 = vmatprep.subr.bf16.mxu0 %v4612_v1 }
 0x1d8   :  { %3961 = vmatmul.mubr.msk.bf16.vlgmr.msra.gmra.mrb[8].mxu0 %vm377_vm3, %v4445_v47  ;;  %3967 = vmatmul.mubr.msk.bf16.vlgmr.msra.gmra.mrb[4].mxu1 %vm377_vm3, %v4447_v48  ;;  %v4507_v47 = vld [vmem:[%s5452_s3 + $0x318] sm:$0xff]   ;;  %v4508_v48 = vld [vmem:[%s5452_s3 + $0x320] sm:$0xff]  }
 0x1d9   :  { %3971 = vmatpush3.bf16.msra.mxu1 %v4448_v49  ;;  %3997 = vmatpush3.bf16.msra.mxu0 %v4449_v50  ;;  %v4509_v49 = vld [vmem:[%s5452_s3 + $0x328] sm:$0xff]  }
 0x1da   :  { %3972 = vmatprep.subr.bf16.mxu1 %v4612_v1  ;;  %3998 = vmatprep.subr.bf16.mxu0 %v4612_v1 }
 0x1db   :  { %3986 = vmatprep.mubr.msk.bf16.mxu1 %vm4613_vm0, %v4612_v1  ;;  %4012 = vmatprep.mubr.msk.bf16.mxu0 %vm4613_vm0, %v4612_v1 }
 0x1dd   :  { %3973 = vmatpush3.bf16.msra.mxu1 %v4450_v51  ;;  %3999 = vmatpush3.bf16.msra.mxu0 %v4451_v52 }
 0x1de   :  { %3974 = vmatprep.subr.bf16.mxu1 %v4612_v1  ;;  %4000 = vmatprep.subr.bf16.mxu0 %v4612_v1 }
 0x1e1   :  { %3975 = vmatpush3.bf16.msra.mxu1 %v4452_v53  ;;  %4001 = vmatpush3.bf16.msra.mxu0 %v4453_v54  ;;  %v4510_v53 = vld [vmem:[%s5452_s3 + $0x330] sm:$0xff]  }
 0x1e2   :  { %3976 = vmatprep.subr.bf16.mxu1 %v4612_v1  ;;  %4002 = vmatprep.subr.bf16.mxu0 %v4612_v1 }
 0x1e5   :  { %3977 = vmatpush3.bf16.msra.mxu1 %v4454_v55  ;;  %4003 = vmatpush3.bf16.msra.mxu0 %v4455_v56  ;;  %v4511_v55 = vld [vmem:[%s5452_s3 + $0x338] sm:$0xff]   ;;  %v4512_v56 = vld [vmem:[%s5452_s3 + $0x380] sm:$0xff]  }
 0x1e6   :  { %3978 = vmatprep.subr.bf16.mxu1 %v4612_v1  ;;  %4004 = vmatprep.subr.bf16.mxu0 %v4612_v1 }
 0x1e9   :  { %3979 = vmatpush3.bf16.msra.mxu1 %v4456_v57  ;;  %4005 = vmatpush3.bf16.msra.mxu0 %v4457_v58  ;;  %v4513_v57 = vld [vmem:[%s5452_s3 + $0x388] sm:$0xff]   ;;  %v4514_v58 = vld [vmem:[%s5452_s3 + $0x390] sm:$0xff]  }
 0x1ea   :  { %3980 = vmatprep.subr.bf16.mxu1 %v4612_v1  ;;  %4006 = vmatprep.subr.bf16.mxu0 %v4612_v1 }
 0x1ed   :  { %3981 = vmatpush3.bf16.msra.mxu1 %v4458_v59  ;;  %4007 = vmatpush3.bf16.msra.mxu0 %v4459_v60  ;;  %v4515_v59 = vld [vmem:[%s5452_s3 + $0x398] sm:$0xff]   ;;  %v4516_v60 = vld [vmem:[%s5452_s3 + $0x3a0] sm:$0xff]  }
 0x1ee   :  { %3982 = vmatprep.subr.bf16.mxu1 %v4612_v1  ;;  %4008 = vmatprep.subr.bf16.mxu0 %v4612_v1 }
 0x1f1   :  { %3983 = vmatpush3.bf16.msra.mxu1 %v4460_v61  ;;  %4009 = vmatpush3.bf16.msra.mxu0 %v4461_v62  ;;  %v4517_v61 = vld [vmem:[%s5452_s3 + $0x3a8] sm:$0xff]  }
 0x1f2   :  { %3984 = vmatprep.subr.bf16.mxu1 %v4612_v1  ;;  %4010 = vmatprep.subr.bf16.mxu0 %v4612_v1 }
 0x1f5   :  { %3985 = vmatpush3.bf16.msra.mxu1 %v4462_v63  ;;  %4011 = vmatpush3.bf16.msra.mxu0 %v4463_v0 }
 0x1f6   :  { %4022 = vmatprep.subr.bf16.mxu0 %v4612_v1 }
 0x1f8   :  { %3987 = vmatmul.mubr.bf16.vlgmr.msra.gmra.mrb[8].mxu1 %v4755_v34  ;;  %4013 = vmatmul.mubr.bf16.vlgmr.msra.gmra.mrb[12].mxu0 %v4755_v34 }
 0x1f9   :  { %4023 = vmatpush3.bf16.msra.mxu0 %v4464_v2  ;;  %4038 = vmatprep.mubr.msk.bf16.mxu0 %vm4613_vm0, %v4612_v1 }
 0x1fa   :  { %4024 = vmatprep.subr.bf16.mxu0 %v4612_v1  ;;  %3992 = vmatprep.mubr.msk.bf16.mxu1 %vm377_vm3, %v4519_v26  ;;  %v4531_v26 = vld [vmem:[%s5452_s3 + $0x168] sm:$0xff]  }
 0x1fd   :  { %4025 = vmatpush3.bf16.msra.mxu0 %v4465_v3 }
 0x1fe   :  { %4026 = vmatprep.subr.bf16.mxu0 %v4612_v1 }
 0x201   :  { %4027 = vmatpush3.bf16.msra.mxu0 %v4466_v4 }
 0x202   :  { %4028 = vmatprep.subr.bf16.mxu0 %v4612_v1 }
 0x205   :  { %4029 = vmatpush3.bf16.msra.mxu0 %v4467_v5  ;;  %v4518_v5 = vld [vmem:[%s5452_s3 + $0x3b0] sm:$0xff]  }
 0x206   :  { %4030 = vmatprep.subr.bf16.mxu0 %v4612_v1 }
 0x209   :  { %4031 = vmatpush3.bf16.msra.mxu0 %v4468_v6 }
 0x20a   :  { %4032 = vmatprep.subr.bf16.mxu0 %v4612_v1 }
 0x20d   :  { %4033 = vmatpush3.bf16.msra.mxu0 %v4469_v7 }
 0x20e   :  { %4034 = vmatprep.subr.bf16.mxu0 %v4612_v1 }
 0x211   :  { %4035 = vmatpush3.bf16.msra.mxu0 %v4470_v8 }
 0x212   :  { %4036 = vmatprep.subr.bf16.mxu0 %v4612_v1 }
 0x215   :  { %4037 = vmatpush3.bf16.msra.mxu0 %v4471_v9 }
 0x216   :  { %4074 = vmatprep.subr.bf16.mxu0 %v4612_v1 }
 0x218   :  { %4039 = vmatmul.mubr.bf16.vlgmr.msra.gmra.mrb[16].mxu0 %v4755_v34 }
 0x219   :  { %4075 = vmatpush3.bf16.msra.mxu0 %v4472_v10  ;;  %4090 = vmatprep.mubr.msk.bf16.mxu0 %vm4613_vm0, %v4612_v1  ;;  %v4520_v10 = vld [vmem:[%s5451_s2 + $0x28] sm:$0xff]  }
 0x21a   :  { %4076 = vmatprep.subr.bf16.mxu0 %v4612_v1 }
 0x21d   :  { %4077 = vmatpush3.bf16.msra.mxu0 %v4473_v11  ;;  %v4521_v11 = vld [vmem:[%s5452_s3 + $0x3b8] sm:$0xff]  }
 0x21e   :  { %4078 = vmatprep.subr.bf16.mxu0 %v4612_v1 }
 0x221   :  { %4079 = vmatpush3.bf16.msra.mxu0 %v4474_v12  ;;  %v4522_v12 = vld [vmem:[%s5451_s2 + $0x30] sm:$0xff]  }
 0x222   :  { %4080 = vmatprep.subr.bf16.mxu0 %v4612_v1 }
 0x225   :  { %4081 = vmatpush3.bf16.msra.mxu0 %v4475_v13  ;;  %v4523_v13 = vld [vmem:[%s5451_s2 + $0x38] sm:$0xff]  }
 0x226   :  { %4082 = vmatprep.subr.bf16.mxu0 %v4612_v1 }
 0x229   :  { %4083 = vmatpush3.bf16.msra.mxu0 %v4476_v14  ;;  %v4524_v14 = vld [vmem:[%s5451_s2 + $0x40] sm:$0xff]  }
 0x22a   :  { %4084 = vmatprep.subr.bf16.mxu0 %v4612_v1 }
 0x22d   :  { %4085 = vmatpush3.bf16.msra.mxu0 %v4477_v15 }
 0x22e   :  { %4086 = vmatprep.subr.bf16.mxu0 %v4612_v1 }
 0x231   :  { %4087 = vmatpush3.bf16.msra.mxu0 %v4478_v16 }
 0x232   :  { %4088 = vmatprep.subr.bf16.mxu0 %v4612_v1 }
 0x235   :  { %4089 = vmatpush3.bf16.msra.mxu0 %v4479_v17 }
 0x236   :  { %4126 = vmatprep.subr.bf16.mxu0 %v4612_v1 }
 0x238   :  { %4091 = vmatmul.mubr.bf16.vlgmr.msra.gmra.mrb[20].mxu0 %v4755_v34 }
 0x239   :  { %4127 = vmatpush3.bf16.msra.mxu0 %v4480_v18  ;;  %4142 = vmatprep.mubr.msk.bf16.mxu0 %vm4613_vm0, %v4612_v1 }
 0x23a   :  { %4128 = vmatprep.subr.bf16.mxu0 %v4612_v1 }
 0x23d   :  { %4129 = vmatpush3.bf16.msra.mxu0 %v4481_v19 }
 0x23e   :  { %4130 = vmatprep.subr.bf16.mxu0 %v4612_v1 }
 0x241   :  { %4131 = vmatpush3.bf16.msra.mxu0 %v4482_v20  ;;  %v4525_v20 = vld [vmem:[%s5451_s2 + $0x48] sm:$0xff]  }
 0x242   :  { %4132 = vmatprep.subr.bf16.mxu0 %v4612_v1 }
 0x245   :  { %4133 = vmatpush3.bf16.msra.mxu0 %v4483_v21  ;;  %v4526_v21 = vld [vmem:[%s5452_s3 + $0x140] sm:$0xff]  }
 0x246   :  { %4134 = vmatprep.subr.bf16.mxu0 %v4612_v1 }
 0x249   :  { %4135 = vmatpush3.bf16.msra.mxu0 %v4484_v22  ;;  %v4527_v22 = vld [vmem:[%s5452_s3 + $0x148] sm:$0xff]  }
 0x24a   :  { %4136 = vmatprep.subr.bf16.mxu0 %v4612_v1 }
 0x24d   :  { %4137 = vmatpush3.bf16.msra.mxu0 %v4485_v23  ;;  %v4528_v23 = vld [vmem:[%s5452_s3 + $0x150] sm:$0xff]  }
 0x24e   :  { %4138 = vmatprep.subr.bf16.mxu0 %v4612_v1 }
 0x251   :  { %4139 = vmatpush3.bf16.msra.mxu0 %v4486_v24  ;;  %v4529_v24 = vld [vmem:[%s5452_s3 + $0x158] sm:$0xff]  }
 0x252   :  { %4140 = vmatprep.subr.bf16.mxu0 %v4612_v1 }
 0x255   :  { %4141 = vmatpush3.bf16.msra.mxu0 %v4487_v25  ;;  %v4530_v25 = vld [vmem:[%s5452_s3 + $0x160] sm:$0xff]  }
 0x256   :  { %4152 = vmatprep.subr.bf16.mxu0 %v4612_v1 }
 0x258   :  { %4143 = vmatmul.mubr.bf16.vlgmr.msra.gmra.mrb[24].mxu0 %v4755_v34 }
 0x259   :  { %4153 = vmatpush3.bf16.msra.mxu0 %v4488_v27  ;;  %4168 = vmatprep.mubr.msk.bf16.mxu0 %vm4613_vm0, %v4612_v1  ;;  %v4532_v27 = vld [vmem:[%s5452_s3 + $0x170] sm:$0xff]  }
 0x25a   :  { %4154 = vmatprep.subr.bf16.mxu0 %v4612_v1 }
 0x25d   :  { %4155 = vmatpush3.bf16.msra.mxu0 %v4489_v28 }
 0x25e   :  { %4156 = vmatprep.subr.bf16.mxu0 %v4612_v1 }
 0x261   :  { %4157 = vmatpush3.bf16.msra.mxu0 %v4490_v29 }
 0x262   :  { %4158 = vmatprep.subr.bf16.mxu0 %v4612_v1 }
 0x265   :  { %4159 = vmatpush3.bf16.msra.mxu0 %v4491_v30 }
 0x266   :  { %4160 = vmatprep.subr.bf16.mxu0 %v4612_v1 }
 0x269   :  { %4161 = vmatpush3.bf16.msra.mxu0 %v4492_v31  ;;  %v4533_v31 = vld [vmem:[%s5452_s3 + $0x178] sm:$0xff]  }
 0x26a   :  { %4162 = vmatprep.subr.bf16.mxu0 %v4612_v1 }
 0x26d   :  { %4163 = vmatpush3.bf16.msra.mxu0 %v4493_v32 }
 0x26e   :  { %4164 = vmatprep.subr.bf16.mxu0 %v4612_v1 }
 0x271   :  { %4165 = vmatpush3.bf16.msra.mxu0 %v4494_v33 }
 0x272   :  { %4166 = vmatprep.subr.bf16.mxu0 %v4612_v1 }
 0x275   :  { %4167 = vmatpush3.bf16.msra.mxu0 %v4495_v35 }
 0x276   :  { %4204 = vmatprep.subr.bf16.mxu0 %v4612_v1 }
 0x278   :  { %4169 = vmatmul.mubr.bf16.vlgmr.msra.gmra.mrb[28].mxu0 %v4755_v34 }
 0x279   :  { %4205 = vmatpush3.bf16.msra.mxu0 %v4496_v36  ;;  %4220 = vmatprep.mubr.msk.bf16.mxu0 %vm4613_vm0, %v4612_v1 }
 0x27a   :  { %4206 = vmatprep.subr.bf16.mxu0 %v4612_v1 }
 0x27d   :  { %4207 = vmatpush3.bf16.msra.mxu0 %v4497_v37 }
 0x27e   :  { %4208 = vmatprep.subr.bf16.mxu0 %v4612_v1 }
 0x281   :  { %4209 = vmatpush3.bf16.msra.mxu0 %v4498_v38 }
 0x282   :  { %4210 = vmatprep.subr.bf16.mxu0 %v4612_v1 }
 0x285   :  { %4211 = vmatpush3.bf16.msra.mxu0 %v4499_v39 }
 0x286   :  { %4212 = vmatprep.subr.bf16.mxu0 %v4612_v1 }
 0x289   :  { %4213 = vmatpush3.bf16.msra.mxu0 %v4500_v40 }
 0x28a   :  { %4214 = vmatprep.subr.bf16.mxu0 %v4612_v1 }
 0x28d   :  { %4215 = vmatpush3.bf16.msra.mxu0 %v4501_v41 }
 0x28e   :  { %4216 = vmatprep.subr.bf16.mxu0 %v4612_v1 }
 0x291   :  { %4217 = vmatpush3.bf16.msra.mxu0 %v4502_v42 }
 0x292   :  { %4218 = vmatprep.subr.bf16.mxu0 %v4612_v1 }
 0x295   :  { %4219 = vmatpush3.bf16.msra.mxu0 %v4503_v43 }
 0x296   :  { %4230 = vmatprep.subr.bf16.mxu0 %v4612_v1 }
 0x298   :  { %4221 = vmatmul.mubr.bf16.vlgmr.msra.gmra.mrb[32].mxu0 %v4755_v34 }
 0x299   :  { %4231 = vmatpush3.bf16.msra.mxu0 %v4504_v44  ;;  %4246 = vmatprep.mubr.msk.bf16.mxu0 %vm4613_vm0, %v4612_v1 }
 0x29a   :  { %4232 = vmatprep.subr.bf16.mxu0 %v4612_v1 }
 0x29d   :  { %4233 = vmatpush3.bf16.msra.mxu0 %v4505_v45 }
 0x29e   :  { %4234 = vmatprep.subr.bf16.mxu0 %v4612_v1 }
 0x2a1   :  { %4235 = vmatpush3.bf16.msra.mxu0 %v4506_v46 }
 0x2a2   :  { %4236 = vmatprep.subr.bf16.mxu0 %v4612_v1 }
 0x2a5   :  { %4237 = vmatpush3.bf16.msra.mxu0 %v4507_v47 }
 0x2a6   :  { %4238 = vmatprep.subr.bf16.mxu0 %v4612_v1 }
 0x2a9   :  { %4239 = vmatpush3.bf16.msra.mxu0 %v4508_v48  ;;  %v4534_v48 = vld [vmem:[%s5451_s2 + $0x50] sm:$0xff]  }
 0x2aa   :  { %4240 = vmatprep.subr.bf16.mxu0 %v4612_v1 }
 0x2ab   :  { %v5050_v50 = vpop.f32.mrb[8].mxu0 }
 0x2ac   :  { %v5052_v51 = vpop.f32.mrb[9].mxu0 }
 0x2ad   :  { %v5054_v52 = vpop.f32.mrb[10].mxu0  ;;  %4241 = vmatpush3.bf16.msra.mxu0 %v4509_v49 }
 0x2ae   :  { %v5059_v54 = vpop.f32.mrb[11].mxu0  ;;  %4242 = vmatprep.subr.bf16.mxu0 %v4612_v1 }
 0x2b1   :  { %4243 = vmatpush3.bf16.msra.mxu0 %v4510_v53 }
 0x2b2   :  { %4244 = vmatprep.subr.bf16.mxu0 %v4612_v1 }
 0x2b5   :  { %4245 = vmatpush3.bf16.msra.mxu0 %v4511_v55 }
 0x2b6   :  { %4282 = vmatprep.subr.bf16.mxu0 %v4612_v1 }
 0x2b8   :  { %4247 = vmatmul.mubr.bf16.vlgmr.msra.gmra.mrb[36].mxu0 %v4755_v34 }
 0x2b9   :  { %4283 = vmatpush3.bf16.msra.mxu0 %v4512_v56  ;;  %4298 = vmatprep.mubr.msk.bf16.mxu0 %vm4613_vm0, %v4612_v1 }
 0x2ba   :  { %4284 = vmatprep.subr.bf16.mxu0 %v4612_v1 }
 0x2bd   :  { %4285 = vmatpush3.bf16.msra.mxu0 %v4513_v57 }
 0x2be   :  { %4286 = vmatprep.subr.bf16.mxu0 %v4612_v1 }
 0x2c1   :  { %4287 = vmatpush3.bf16.msra.mxu0 %v4514_v58 }
 0x2c2   :  { %4288 = vmatprep.subr.bf16.mxu0 %v4612_v1 }
 0x2c5   :  { %4289 = vmatpush3.bf16.msra.mxu0 %v4515_v59 }
 0x2c6   :  { %4290 = vmatprep.subr.bf16.mxu0 %v4612_v1 }
 0x2c9   :  { %4291 = vmatpush3.bf16.msra.mxu0 %v4516_v60 }
 0x2ca   :  { %4292 = vmatprep.subr.bf16.mxu0 %v4612_v1 }
 0x2cb   :  { %v597_v62 = vpop.f32.mrb[8].mxu1  ;;  %v778_v63 = vpop.f32.mrb[12].mxu0 }
 0x2cc   :  { %v3988_v0 = vpop.f32.mrb[9].mxu1  ;;  %v4014_v2 = vpop.f32.mrb[13].mxu0 }
 0x2cd   :  { %v600_v3 = vpop.f32.mrb[10].mxu1  ;;  %v781_v4 = vpop.f32.mrb[14].mxu0  ;;  %4293 = vmatpush3.bf16.msra.mxu0 %v4517_v61 }
 0x2ce   :  { %v609_v6 = vpack.c.bf16 %v600_v3, %v597_v62  ;;  %v790_v7 = vpack.c.bf16 %v781_v4, %v778_v63  ;;  %v3989_v8 = vpop.f32.mrb[11].mxu1  ;;  %v4015_v9 = vpop.f32.mrb[15].mxu0  ;;  %4294 = vmatprep.subr.bf16.mxu0 %v4612_v1 }
 0x2cf   :  { %v4536_v8 = vld [vmem:[%s5451_s2 + $0x60] sm:$0xff]   ;;  %v4537_v9 = vld [vmem:[%s5451_s2 + $0x68] sm:$0xff]  }
 0x2d0   :  { %3990 = vmatprep.subr.bf16.mxu1 %v609_v6 }
 0x2d1   :  { %3991 = vmatpush3.bf16.msra.mxu1 %v609_v6  ;;  %4295 = vmatpush3.bf16.msra.mxu0 %v4518_v5 }
 0x2d2   :  { %4016 = vmatprep.subr.bf16.mxu1 %v790_v7  ;;  %4296 = vmatprep.subr.bf16.mxu0 %v4612_v1 }
 0x2d4   :  { %3993 = vmatmul.mubr.msk.bf16.vlgmr.msra.gmra.mrb[4].mxu1 %vm377_vm3, %v4520_v10  ;;  %v4538_v10 = vld [vmem:[%s5452_s3 + $0x1c0] sm:$0xff]  }
 0x2d5   :  { %4017 = vmatpush3.bf16.msra.mxu1 %v790_v7  ;;  %4297 = vmatpush3.bf16.msra.mxu0 %v4521_v11  ;;  %v4535_v7 = vld [vmem:[%s5451_s2 + $0x58] sm:$0xff]   ;;  %v4539_v11 = vld [vmem:[%s5452_s3 + $0x1c8] sm:$0xff]  }
 0x2d6   :  { %4018 = vmatprep.mubr.msk.bf16.mxu1 %vm377_vm3, %v4522_v12  ;;  %v4540_v12 = vld [vmem:[%s5452_s3 + $0x1d0] sm:$0xff]  }
 0x2d8   :  { %4299 = vmatmul.mubr.bf16.vlgmr.msra.gmra.mrb[40].mxu0 %v4755_v34 }
 0x2e0   :  { %4019 = vmatmul.mubr.msk.bf16.vlgmr.msra.gmra.mrb[4].mxu1 %vm377_vm3, %v4523_v13  ;;  %v4541_v13 = vld [vmem:[%s5452_s3 + $0x1d8] sm:$0xff]  }
 0x2e1   :  { %4044 = vmatprep.mubr.msk.bf16.mxu1 %vm377_vm3, %v4524_v14  ;;  %v4542_v14 = vld [vmem:[%s5452_s3 + $0x1e0] sm:$0xff]  }
 0x2eb   :  { %v959_v15 = vpop.f32.mrb[16].mxu0 }
 0x2ec   :  { %v4040_v16 = vpop.f32.mrb[17].mxu0 }
 0x2ed   :  { %v962_v17 = vpop.f32.mrb[18].mxu0  ;;  %v4544_v16 = vld [vmem:[%s5452_s3 + $0x1f0] sm:$0xff]  }
 0x2ee   :  { %v971_v18 = vpack.c.bf16 %v962_v17, %v959_v15  ;;  %v4041_v19 = vpop.f32.mrb[19].mxu0  ;;  %v4543_v15 = vld [vmem:[%s5452_s3 + $0x1e8] sm:$0xff]   ;;  %v4545_v17 = vld [vmem:[%s5452_s3 + $0x1f8] sm:$0xff]  }
 0x2f0   :  { %4042 = vmatprep.subr.bf16.mxu1 %v971_v18 }
 0x2f1   :  { %4043 = vmatpush3.bf16.msra.mxu1 %v971_v18  ;;  %v4546_v18 = vld [vmem:[%s5451_s2 + $0x70] sm:$0xff]  }
 0x2f2   :  { %4048 = vmatprep.subr.bf16.mxu1 %v4612_v1 }
 0x2f4   :  { %4045 = vmatmul.mubr.msk.bf16.vlgmr.msra.gmra.mrb[4].mxu1 %vm377_vm3, %v4525_v20 }
 0x2f5   :  { %4049 = vmatpush3.bf16.msra.mxu1 %v4526_v21  ;;  %4064 = vmatprep.mubr.msk.bf16.mxu1 %vm4613_vm0, %v4612_v1 }
 0x2f6   :  { %4050 = vmatprep.subr.bf16.mxu1 %v4612_v1 }
 0x2f9   :  { %4051 = vmatpush3.bf16.msra.mxu1 %v4527_v22 }
 0x2fa   :  { %4052 = vmatprep.subr.bf16.mxu1 %v4612_v1 }
 0x2fd   :  { %4053 = vmatpush3.bf16.msra.mxu1 %v4528_v23 }
 0x2fe   :  { %4054 = vmatprep.subr.bf16.mxu1 %v4612_v1 }
 0x301   :  { %4055 = vmatpush3.bf16.msra.mxu1 %v4529_v24  ;;  %v4547_v24 = vld [vmem:[%s5451_s2 + $0x78] sm:$0xff]  }
 0x302   :  { %4056 = vmatprep.subr.bf16.mxu1 %v4612_v1 }
 0x305   :  { %4057 = vmatpush3.bf16.msra.mxu1 %v4530_v25  ;;  %v4548_v25 = vld [vmem:[%s5451_s2 + $0x80] sm:$0xff]  }
 0x306   :  { %4058 = vmatprep.subr.bf16.mxu1 %v4612_v1 }
 0x309   :  { %4059 = vmatpush3.bf16.msra.mxu1 %v4531_v26  ;;  %v4549_v26 = vld [vmem:[%s5451_s2 + $0x88] sm:$0xff]  }
 0x30a   :  { %4060 = vmatprep.subr.bf16.mxu1 %v4612_v1 }
 0x30b   :  { %v1321_v28 = vpop.f32.mrb[20].mxu0 }
 0x30c   :  { %v4092_v29 = vpop.f32.mrb[21].mxu0 }
 0x30d   :  { %4061 = vmatpush3.bf16.msra.mxu1 %v4532_v27  ;;  %v1324_v30 = vpop.f32.mrb[22].mxu0  ;;  %v4550_v27 = vld [vmem:[%s5451_s2 + $0x90] sm:$0xff]   ;;  %v4552_v29 = vld [vmem:[%s5452_s3 + $0x280] sm:$0xff]  }
 0x30e   :  { %v1333_v32 = vpack.c.bf16 %v1324_v30, %v1321_v28  ;;  %v4093_v33 = vpop.f32.mrb[23].mxu0  ;;  %4062 = vmatprep.subr.bf16.mxu1 %v4612_v1  ;;  %v4551_v28 = vld [vmem:[%s5451_s2 + $0x98] sm:$0xff]   ;;  %v4553_v30 = vld [vmem:[%s5452_s3 + $0x288] sm:$0xff]  }
 0x30f   :  { %v4556_v33 = vld [vmem:[%s5452_s3 + $0x2a0] sm:$0xff]  }
 0x311   :  { %4063 = vmatpush3.bf16.msra.mxu1 %v4533_v31  ;;  %v4554_v31 = vld [vmem:[%s5452_s3 + $0x290] sm:$0xff]  }
 0x314   :  { %4065 = vmatmul.mubr.bf16.vlgmr.msra.gmra.mrb[12].mxu1 %v4755_v34 }
 0x315   :  { %4070 = vmatprep.mubr.msk.bf16.mxu1 %vm377_vm3, %v4534_v48  ;;  %v4565_v48 = vld [vmem:[%s5451_s2 + $0xc8] sm:$0xff]  }
 0x32b   :  { %v1683_v35 = vpop.f32.mrb[24].mxu0 }
 0x32c   :  { %v4144_v36 = vpop.f32.mrb[25].mxu0 }
 0x32d   :  { %v1686_v37 = vpop.f32.mrb[26].mxu0  ;;  %v4558_v36 = vld [vmem:[%s5452_s3 + $0x2b0] sm:$0xff]  }
 0x32e   :  { %v5157_v38 = vpack.c.bf16 %v1686_v37, %v1683_v35  ;;  %v4145_v39 = vpop.f32.mrb[27].mxu0  ;;  %v4557_v35 = vld [vmem:[%s5452_s3 + $0x2a8] sm:$0xff]   ;;  %v4559_v37 = vld [vmem:[%s5452_s3 + $0x2b8] sm:$0xff]  }
 0x34b   :  { %v1864_v40 = vpop.f32.mrb[28].mxu0 }
 0x34c   :  { %v4170_v41 = vpop.f32.mrb[29].mxu0 }
 0x34d   :  { %v1867_v42 = vpop.f32.mrb[30].mxu0 }
 0x34e   :  { %v5159_v43 = vpack.c.bf16 %v1867_v42, %v1864_v40  ;;  %v4171_v44 = vpop.f32.mrb[31].mxu0 }
 0x34f   :  { %v4561_v44 = vld [vmem:[%s5451_s2 + $0xa8] sm:$0xff]  }
 0x36b   :  { %v2226_v45 = vpop.f32.mrb[32].mxu0 }
 0x36c   :  { %v4222_v46 = vpop.f32.mrb[33].mxu0 }
 0x36d   :  { %v2229_v47 = vpop.f32.mrb[34].mxu0  ;;  %v4563_v46 = vld [vmem:[%s5451_s2 + $0xb8] sm:$0xff]  }
 0x36e   :  { %v5164_v49 = vpack.c.bf16 %v2229_v47, %v2226_v45  ;;  %v4223_v53 = vpop.f32.mrb[35].mxu0  ;;  %v4562_v45 = vld [vmem:[%s5451_s2 + $0xb0] sm:$0xff]   ;;  %v4564_v47 = vld [vmem:[%s5451_s2 + $0xc0] sm:$0xff]  }
 0x36f   :  { %v4567_v53 = vld [vmem:[%s5452_s3 + $0x348] sm:$0xff]  }
 0x38b   :  { %v2407_v55 = vpop.f32.mrb[36].mxu0 }
 0x38c   :  { %v4248_v56 = vpop.f32.mrb[37].mxu0 }
 0x38d   :  { %v2410_v57 = vpop.f32.mrb[38].mxu0  ;;  %v4569_v56 = vld [vmem:[%s5452_s3 + $0x358] sm:$0xff]  }
 0x38e   :  { %v5167_v58 = vpack.c.bf16 %v2410_v57, %v2407_v55  ;;  %v4249_v59 = vpop.f32.mrb[39].mxu0  ;;  %v4568_v55 = vld [vmem:[%s5452_s3 + $0x350] sm:$0xff]   ;;  %v4570_v57 = vld [vmem:[%s5452_s3 + $0x360] sm:$0xff]  }
 0x38f   :  { %v4572_v59 = vld [vmem:[%s5452_s3 + $0x370] sm:$0xff]  }
 0x3ab   :  { %v2769_v60 = vpop.f32.mrb[40].mxu0 }
 0x3ac   :  { %v4300_v61 = vpop.f32.mrb[41].mxu0 }
 0x3ad   :  { %v2772_v62 = vpop.f32.mrb[42].mxu0  ;;  %v4574_v61 = vld [vmem:[%s5451_s2 + $0xd0] sm:$0xff]  }
 0x3ae   :  { %v5169_v63 = vpack.c.bf16 %v2772_v62, %v2769_v60  ;;  %v4301_v0 = vpop.f32.mrb[43].mxu0  ;;  %v4573_v60 = vld [vmem:[%s5452_s3 + $0x378] sm:$0xff]  }
 0x3e7   :  { %v1140_v2 = vpop.f32.mrb[12].mxu1 }
 0x3e8   :  { %v4066_v3 = vpop.f32.mrb[13].mxu1 }
 0x3e9   :  { %v1143_v4 = vpop.f32.mrb[14].mxu1 }
 0x3ea   :  { %v1152_v5 = vpack.c.bf16 %v1143_v4, %v1140_v2  ;;  %v4067_v6 = vpop.f32.mrb[15].mxu1 }
 0x3eb   :  { %v4576_v6 = vld [vmem:[%s5451_s2 + $0xe0] sm:$0xff]  }
 0x3ec   :  { %4068 = vmatprep.subr.bf16.mxu1 %v1152_v5 }
 0x3ed   :  { %4069 = vmatpush3.bf16.msra.mxu1 %v1152_v5  ;;  %v4575_v5 = vld [vmem:[%s5451_s2 + $0xd8] sm:$0xff]  }
 0x3ee   :  { %4094 = vmatprep.subr.bf16.mxu1 %v1333_v32 }
 0x3f0   :  { %4071 = vmatmul.mubr.msk.bf16.vlgmr.msra.gmra.mrb[4].mxu1 %vm377_vm3, %v4535_v7  ;;  %v4577_v7 = vld [vmem:[%s5451_s2 + $0xe8] sm:$0xff]  }
 0x3f1   :  { %4095 = vmatpush3.bf16.msra.mxu1 %v1333_v32  ;;  %4096 = vmatprep.mubr.msk.bf16.mxu1 %vm377_vm3, %v4536_v8  ;;  %v4555_v32 = vld [vmem:[%s5452_s3 + $0x298] sm:$0xff]   ;;  %v4578_v8 = vld [vmem:[%s5452_s3 + $0x3c0] sm:$0xff]  }
 0x3f2   :  { %4100 = vmatprep.subr.bf16.mxu1 %v4612_v1 }
 0x3fc   :  { %4097 = vmatmul.mubr.msk.bf16.vlgmr.msra.gmra.mrb[4].mxu1 %vm377_vm3, %v4537_v9  ;;  %v4579_v9 = vld [vmem:[%s5452_s3 + $0x3c8] sm:$0xff]  }
 0x3fd   :  { %4101 = vmatpush3.bf16.msra.mxu1 %v4538_v10  ;;  %4116 = vmatprep.mubr.msk.bf16.mxu1 %vm4613_vm0, %v4612_v1  ;;  %v4581_v10 = vld [vmem:[%s5452_s3 + $0x3d8] sm:$0xff]  }
 0x3fe   :  { %4102 = vmatprep.subr.bf16.mxu1 %v4612_v1 }
 0x401   :  { %4103 = vmatpush3.bf16.msra.mxu1 %v4539_v11  ;;  %v4582_v11 = vld [vmem:[%s5452_s3 + $0x3e0] sm:$0xff]  }
 0x402   :  { %4104 = vmatprep.subr.bf16.mxu1 %v4612_v1 }
 0x405   :  { %4105 = vmatpush3.bf16.msra.mxu1 %v4540_v12  ;;  %v4583_v12 = vld [vmem:[%s5452_s3 + $0x3e8] sm:$0xff]  }
 0x406   :  { %4106 = vmatprep.subr.bf16.mxu1 %v4612_v1 }
 0x409   :  { %4107 = vmatpush3.bf16.msra.mxu1 %v4541_v13  ;;  %v4584_v13 = vld [vmem:[%s5452_s3 + $0x3f0] sm:$0xff]  }
 0x40a   :  { %4108 = vmatprep.subr.bf16.mxu1 %v4612_v1 }
 0x40d   :  { %4109 = vmatpush3.bf16.msra.mxu1 %v4542_v14  ;;  %v4585_v14 = vld [vmem:[%s5452_s3 + $0x3f8] sm:$0xff]  }
 0x40e   :  { %4110 = vmatprep.subr.bf16.mxu1 %v4612_v1 }
 0x411   :  { %4111 = vmatpush3.bf16.msra.mxu1 %v4543_v15  ;;  %v4586_v15 = vld [vmem:[%s5451_s2 + $0xf0] sm:$0xff]  }
 0x412   :  { %4112 = vmatprep.subr.bf16.mxu1 %v4612_v1 }
 0x415   :  { %4113 = vmatpush3.bf16.msra.mxu1 %v4544_v16 }
 0x416   :  { %4114 = vmatprep.subr.bf16.mxu1 %v4612_v1 }
 0x419   :  { %4115 = vmatpush3.bf16.msra.mxu1 %v4545_v17 }
 0x41c   :  { %4117 = vmatmul.mubr.bf16.vlgmr.msra.gmra.mrb[16].mxu1 %v4755_v34 }
 0x41d   :  { %4122 = vmatprep.mubr.msk.bf16.mxu1 %vm377_vm3, %v4546_v18 }
 0x4ef   :  { %v1502_v19 = vpop.f32.mrb[16].mxu1 }
 0x4f0   :  { %v4118_v20 = vpop.f32.mrb[17].mxu1 }
 0x4f1   :  { %v1505_v21 = vpop.f32.mrb[18].mxu1 }
 0x4f2   :  { %v1514_v22 = vpack.c.bf16 %v1505_v21, %v1502_v19  ;;  %v4119_v23 = vpop.f32.mrb[19].mxu1  ;;  %v4587_v21 = vld [vmem:[%s5451_s2 + $0xf8] sm:$0xff]  }
 0x4f3   :  { %v3054_v23 = vld [vmem:[%s5454_s5 + $0x10] sm:$0xff] }
 0x4f4   :  { %4120 = vmatprep.subr.bf16.mxu1 %v1514_v22 }
 0x4f5   :  { %4121 = vmatpush3.bf16.msra.mxu1 %v1514_v22 }
 0x4f6   :  { %4146 = vmatprep.subr.bf16.mxu1 %v5157_v38 }
 0x4f8   :  { %4123 = vmatmul.mubr.msk.bf16.vlgmr.msra.gmra.mrb[4].mxu1 %vm377_vm3, %v4547_v24  ;;  %v3055_v24 = vld [vmem:[%s5454_s5 + $0x18] sm:$0xff] }
 0x4f9   :  { %4147 = vmatpush3.bf16.msra.mxu1 %v5157_v38  ;;  %4148 = vmatprep.mubr.msk.bf16.mxu1 %vm377_vm3, %v4548_v25  ;;  %v4560_v38 = vld [vmem:[%s5451_s2 + $0xa0] sm:$0xff]   ;;  %v4352_v25 = vpack.c.bf16 %v3055_v24, %v3054_v23 }
 0x4fa   :  { %4172 = vmatprep.subr.bf16.mxu1 %v5159_v43 }
 0x504   :  { %4149 = vmatmul.mubr.msk.bf16.vlgmr.msra.gmra.mrb[4].mxu1 %vm377_vm3, %v4549_v26 }
 0x505   :  { %4173 = vmatpush3.bf16.msra.mxu1 %v5159_v43  ;;  %4174 = vmatprep.mubr.msk.bf16.mxu1 %vm377_vm3, %v4550_v27 }
 0x506   :  { %4178 = vmatprep.subr.bf16.mxu1 %v4612_v1 }
 0x510   :  { %4175 = vmatmul.mubr.msk.bf16.vlgmr.msra.gmra.mrb[4].mxu1 %vm377_vm3, %v4551_v28 }
 0x511   :  { %4179 = vmatpush3.bf16.msra.mxu1 %v4552_v29  ;;  %4194 = vmatprep.mubr.msk.bf16.mxu1 %vm4613_vm0, %v4612_v1 }
 0x512   :  { %4180 = vmatprep.subr.bf16.mxu1 %v4612_v1 }
 0x515   :  { %4181 = vmatpush3.bf16.msra.mxu1 %v4553_v30 }
 0x516   :  { %4182 = vmatprep.subr.bf16.mxu1 %v4612_v1 }
 0x519   :  { %4183 = vmatpush3.bf16.msra.mxu1 %v4554_v31 }
 0x51a   :  { %4184 = vmatprep.subr.bf16.mxu1 %v4612_v1 }
 0x51d   :  { %4185 = vmatpush3.bf16.msra.mxu1 %v4555_v32 }
 0x51e   :  { %4186 = vmatprep.subr.bf16.mxu1 %v4612_v1 }
 0x521   :  { %4187 = vmatpush3.bf16.msra.mxu1 %v4556_v33 }
 0x522   :  { %4188 = vmatprep.subr.bf16.mxu1 %v4612_v1 }
 0x525   :  { %4189 = vmatpush3.bf16.msra.mxu1 %v4557_v35 }
 0x526   :  { %4190 = vmatprep.subr.bf16.mxu1 %v4612_v1 }
 0x529   :  { %4191 = vmatpush3.bf16.msra.mxu1 %v4558_v36  ;;  %v3044_v36 = vld [vmem:[%s5453_s4] sm:$0xff] }
 0x52a   :  { %4192 = vmatprep.subr.bf16.mxu1 %v4612_v1 }
 0x52d   :  { %4193 = vmatpush3.bf16.msra.mxu1 %v4559_v37 }
 0x530   :  { %4195 = vmatmul.mubr.bf16.vlgmr.msra.gmra.mrb[20].mxu1 %v4755_v34 }
 0x531   :  { %4200 = vmatprep.mubr.msk.bf16.mxu1 %vm377_vm3, %v4560_v38 }
 0x603   :  { %v2045_v39 = vpop.f32.mrb[20].mxu1 }
 0x604   :  { %v4196_v40 = vpop.f32.mrb[21].mxu1 }
 0x605   :  { %v2048_v41 = vpop.f32.mrb[22].mxu1  ;;  %v3046_v40 = vld [vmem:[%s5453_s4 + $0x10] sm:$0xff] }
 0x606   :  { %v2057_v42 = vpack.c.bf16 %v2048_v41, %v2045_v39  ;;  %v4197_v43 = vpop.f32.mrb[23].mxu1 }
 0x608   :  { %4198 = vmatprep.subr.bf16.mxu1 %v2057_v42 }
 0x609   :  { %4199 = vmatpush3.bf16.msra.mxu1 %v2057_v42 }
 0x60a   :  { %4224 = vmatprep.subr.bf16.mxu1 %v5164_v49 }
 0x60c   :  { %4201 = vmatmul.mubr.msk.bf16.vlgmr.msra.gmra.mrb[4].mxu1 %vm377_vm3, %v4561_v44 }
 0x60d   :  { %4225 = vmatpush3.bf16.msra.mxu1 %v5164_v49  ;;  %4226 = vmatprep.mubr.msk.bf16.mxu1 %vm377_vm3, %v4562_v45  ;;  %v4566_v49 = vld [vmem:[%s5452_s3 + $0x340] sm:$0xff]   ;;  %v3047_v45 = vld [vmem:[%s5453_s4 + $0x18] sm:$0xff] }
 0x60e   :  { %4250 = vmatprep.subr.bf16.mxu1 %v5167_v58 }
 0x618   :  { %4227 = vmatmul.mubr.msk.bf16.vlgmr.msra.gmra.mrb[4].mxu1 %vm377_vm3, %v4563_v46 }
 0x619   :  { %4251 = vmatpush3.bf16.msra.mxu1 %v5167_v58  ;;  %4252 = vmatprep.mubr.msk.bf16.mxu1 %vm377_vm3, %v4564_v47  ;;  %v4571_v58 = vld [vmem:[%s5452_s3 + $0x368] sm:$0xff]  }
 0x61a   :  { %4256 = vmatprep.subr.bf16.mxu1 %v4612_v1 }
 0x624   :  { %4253 = vmatmul.mubr.msk.bf16.vlgmr.msra.gmra.mrb[4].mxu1 %vm377_vm3, %v4565_v48 }
 0x625   :  { %4257 = vmatpush3.bf16.msra.mxu1 %v4566_v49  ;;  %4272 = vmatprep.mubr.msk.bf16.mxu1 %vm4613_vm0, %v4612_v1 }
 0x626   :  { %4258 = vmatprep.subr.bf16.mxu1 %v4612_v1 }
 0x629   :  { %4259 = vmatpush3.bf16.msra.mxu1 %v4567_v53 }
 0x62a   :  { %4260 = vmatprep.subr.bf16.mxu1 %v4612_v1 }
 0x62d   :  { %4261 = vmatpush3.bf16.msra.mxu1 %v4568_v55 }
 0x62e   :  { %4262 = vmatprep.subr.bf16.mxu1 %v4612_v1 }
 0x631   :  { %4263 = vmatpush3.bf16.msra.mxu1 %v4569_v56 }
 0x632   :  { %4264 = vmatprep.subr.bf16.mxu1 %v4612_v1 }
 0x635   :  { %4265 = vmatpush3.bf16.msra.mxu1 %v4570_v57 }
 0x636   :  { %4266 = vmatprep.subr.bf16.mxu1 %v4612_v1 }
 0x639   :  { %4267 = vmatpush3.bf16.msra.mxu1 %v4571_v58 }
 0x63a   :  { %4268 = vmatprep.subr.bf16.mxu1 %v4612_v1 }
 0x63d   :  { %4269 = vmatpush3.bf16.msra.mxu1 %v4572_v59 }
 0x63e   :  { %4270 = vmatprep.subr.bf16.mxu1 %v4612_v1 }
 0x641   :  { %4271 = vmatpush3.bf16.msra.mxu1 %v4573_v60 }
 0x644   :  { %4273 = vmatmul.mubr.bf16.vlgmr.msra.gmra.mrb[24].mxu1 %v4755_v34 }
 0x645   :  { %4278 = vmatprep.mubr.msk.bf16.mxu1 %vm377_vm3, %v4574_v61 }
 0x717   :  { %v2588_v62 = vpop.f32.mrb[24].mxu1 }
 0x718   :  { %v4274_v0 = vpop.f32.mrb[25].mxu1 }
 0x719   :  { %v2591_v2 = vpop.f32.mrb[26].mxu1 }
 0x71a   :  { %v2600_v3 = vpack.c.bf16 %v2591_v2, %v2588_v62  ;;  %v4275_v4 = vpop.f32.mrb[27].mxu1 }
 0x71c   :  { %4276 = vmatprep.subr.bf16.mxu1 %v2600_v3 }
 0x71d   :  { %4277 = vmatpush3.bf16.msra.mxu1 %v2600_v3 }
 0x71e   :  { %4302 = vmatprep.subr.bf16.mxu1 %v5169_v63 }
 0x720   :  { %4279 = vmatmul.mubr.msk.bf16.vlgmr.msra.gmra.mrb[4].mxu1 %vm377_vm3, %v4575_v5 }
 0x721   :  { %4303 = vmatpush3.bf16.msra.mxu1 %v5169_v63  ;;  %4304 = vmatprep.mubr.msk.bf16.mxu1 %vm377_vm3, %v4576_v6  ;;  %v4580_v63 = vld [vmem:[%s5452_s3 + $0x3d0] sm:$0xff]  }
 0x722   :  { %4308 = vmatprep.subr.bf16.mxu1 %v4612_v1 }
 0x72c   :  { %4305 = vmatmul.mubr.msk.bf16.vlgmr.msra.gmra.mrb[4].mxu1 %vm377_vm3, %v4577_v7 }
 0x72d   :  { %4309 = vmatpush3.bf16.msra.mxu1 %v4578_v8  ;;  %4324 = vmatprep.mubr.msk.bf16.mxu1 %vm4613_vm0, %v4612_v1 }
 0x72e   :  { %4310 = vmatprep.subr.bf16.mxu1 %v4612_v1 }
 0x731   :  { %4311 = vmatpush3.bf16.msra.mxu1 %v4579_v9 }
 0x732   :  { %4312 = vmatprep.subr.bf16.mxu1 %v4612_v1 }
 0x735   :  { %4313 = vmatpush3.bf16.msra.mxu1 %v4580_v63 }
 0x736   :  { %4314 = vmatprep.subr.bf16.mxu1 %v4612_v1 }
 0x739   :  { %4315 = vmatpush3.bf16.msra.mxu1 %v4581_v10 }
 0x73a   :  { %4316 = vmatprep.subr.bf16.mxu1 %v4612_v1 }
 0x73d   :  { %4317 = vmatpush3.bf16.msra.mxu1 %v4582_v11 }
 0x73e   :  { %4318 = vmatprep.subr.bf16.mxu1 %v4612_v1 }
 0x741   :  { %4319 = vmatpush3.bf16.msra.mxu1 %v4583_v12 }
 0x742   :  { %4320 = vmatprep.subr.bf16.mxu1 %v4612_v1 }
 0x745   :  { %4321 = vmatpush3.bf16.msra.mxu1 %v4584_v13 }
 0x746   :  { %4322 = vmatprep.subr.bf16.mxu1 %v4612_v1  ;;  %v3052_v1 = vld [vmem:[%s5454_s5] sm:$0xff] }
 0x749   :  { %4323 = vmatpush3.bf16.msra.mxu1 %v4585_v14 }
 0x74c   :  { %4325 = vmatmul.mubr.bf16.vlgmr.msra.gmra.mrb[28].mxu1 %v4755_v34  ;;  %v3053_v34 = vld [vmem:[%s5454_s5 + $0x8] sm:$0xff] }
 0x74d   :  { %4330 = vmatprep.mubr.msk.bf16.mxu1 %vm377_vm3, %v4586_v15  ;;  %v4348_v22 = vpack.c.bf16 %v3053_v34, %v3052_v1 }
 0x74f   :  { %4349 = vmatprep.subr.bf16.mxu0 %v4348_v22 }
 0x750   :  { %4351 = vmatpush3.bf16.msra.mxu0 %v4348_v22 }
 0x751   :  { %4353 = vmatprep.subr.bf16.mxu0 %v4352_v25 }
 0x754   :  { %4355 = vmatpush3.bf16.msra.mxu0 %v4352_v25 }
 0x81f   :  { %v2950_v16 = vpop.f32.mrb[28].mxu1 }
 0x820   :  { %v4326_v17 = vpop.f32.mrb[29].mxu1 }
 0x821   :  { %v2953_v18 = vpop.f32.mrb[30].mxu1 }
 0x822   :  { %v2962_v19 = vpack.c.bf16 %v2953_v18, %v2950_v16  ;;  %v4327_v20 = vpop.f32.mrb[31].mxu1 }
 0x824   :  { %4328 = vmatprep.subr.bf16.mxu1 %v2962_v19 }
 0x825   :  { %4329 = vmatpush3.bf16.msra.mxu1 %v2962_v19 }
 0x828   :  { %4331 = vmatmul.mubr.msk.bf16.vlgmr.msra.gmra.mrb[4].mxu1 %vm377_vm3, %v4587_v21 }
 0x8fb   :  { %v4332_v26 = vpop.f32.mrb[4].mxu1 }
 0x8fc   :  { %v4356_v27 = vadd.f32 %v4332_v26, %v5050_v50  ;;  %v3013_v28 = vpop.f32.mrb[5].mxu1 }
 0x8fd   :  { %v4357_v29 = vadd.f32 %v3013_v28, %v5052_v51  ;;  %v4333_v30 = vpop.f32.mrb[6].mxu1  ;;  %v3045_v51 = vld [vmem:[%s5453_s4 + $0x8] sm:$0xff]  ;;  %s4614_s4 = smov [#allocation2]  }
 0x8fe   :  { %v3038_v31 = vmul.f32 0.2, %v4356_v27  ;;  %v4358_v32 = vadd.f32 %v4333_v30, %v5054_v52  ;;  %v3016_v33 = vpop.f32.mrb[7].mxu1  ;;  %vm3034_vm4 = vcmp.gt.f32.partialorder %v4356_v27, 0.0  ;;  %s3176_s10 = sshll.u32 %s4614_s4, 4  ;;  %s3177_s10 = int_to_ptr.vmem [resolvable:$true] %s3176_s10 }
 0x8ff   :  { %vm3032_vm5 = vcmp.gt.f32.partialorder %v4357_v29, 0.0  ;;  %v3036_v35 = vmul.f32 0.2, %v4357_v29  ;;  %v4359_v37 = vadd.f32 %v3016_v33, %v5059_v54  ;;  %s4588_s11 = scalar_lea.vmem %s3177_s10, 16  ;;  %s4592_s12 = scalar_lea.vmem %s3177_s10, 32 }
 0x900   :  { %v3039_v50 = vmul.f32 0.2, %v4358_v32  ;;  %v3042_v52 = vsel %vm3034_vm4, %v4356_v27, %v3038_v31  ;;  %vm3035_vm8 = vcmp.gt.f32.partialorder %v4358_v32, 0.0  ;;  %p4589_p0 = scmp.ne.s32.totalorder %s3177_s10, %s4588_s11  ;;  %p4593_p1 = scmp.lt.s32.totalorder %s3177_s10, %s3177_s10 }
 0x901   :  { %v3040_v38 = vsel %vm3032_vm5, %v4357_v29, %v3036_v35  ;;  %vm3033_vm7 = vcmp.gt.f32.partialorder %v4359_v37, 0.0  ;;  %v3037_v39 = vmul.f32 0.2, %v4359_v37  ;;  %v3050_v54 = vmul.f32 %v3046_v40, %v3042_v52  ;;  %p4594_p2 = scmp.lt.s32.totalorder %s4592_s12, %s4588_s11 }
 0x902   :  { %v3048_v41 = vmul.f32 %v3044_v36, %v3040_v38  ;;  %v3043_v44 = vsel %vm3035_vm8, %v4358_v32, %v3039_v50 }
 0x903   :  { %v3041_v42 = vsel %vm3033_vm7, %v4359_v37, %v3037_v39  ;;  %v3051_v46 = vmul.f32 %v3047_v45, %v3043_v44  ;;  %p4595_p3 = por %p4594_p2, %p4593_p1 }
 0x904   :  { %v3049_v43 = vmul.f32 %v3045_v51, %v3041_v42  ;;  %4342 = vmatprep.mubr.msk.f32.mxu0 %vm3056_vm6, %v3048_v41 }
 0x905   :  { %p4596_p4 = pnand %p4595_p3, %p4589_p0 }
 0x906   :  { %4343 = vmatmul.mubr.msk.f32.vlgmr.msra.gmra.mrb[44].mxu0 %vm3056_vm6, %v3049_v43 }
 0x907   :  { %4345 = vmatprep.mubr.msk.f32.mxu0 %vm3056_vm6, %v3050_v54 }
 0x90a   :  { %4346 = vmatmul.mubr.msk.f32.gmra.mrb[46].mxu0 %vm3056_vm6, %v3051_v46 }
 0x9d9   :  { %v4344_v47 = vpop.f32.mrb[44].mxu0 }
 0x9da   :  { %v3156_v48 = vsel %vm3154_vm9, %v4344_v47, 0.0  ;;  %v3135_v49 = vpop.f32.mrb[45].mxu0 }
 0x9db   :  { %v3155_v53 = vsel %vm3154_vm9, %v3135_v49, 0.0 }
 0x9dc   :  { %v3157_v55 = vadd.f32 %v3156_v48, %v3155_v53 }
 0x9dd   :  { %v4347_v56 = vpop.f32.mrb[46].mxu0 }
 0x9de   :  { %v3145_v57 = vpop.f32.mrb[47].mxu0  ;;  %v3160_v60 = vsel %vm3154_vm9, %v4347_v56, 0.0 }
 0x9df   :  { %v3158_v58 = vsel %vm3154_vm9, %v3145_v57, 0.0 }
 0x9e0   :  { %v3159_v59 = vadd.f32 %v3158_v58, %v3157_v55 }
 0x9e2   :  { %v3161_v61 = vadd.f32 %v3160_v60, %v3159_v59 }
 0x9e4   :  { %v3162_v62 = vrot.slane %v3161_v61, 4 }
 0x9e6   :  { %v3163_v0 = vadd.f32 %v3162_v62, %v3161_v61 }
 0x9e8   :  { %v3164_v2 = vrot.slane %v3163_v0, 2 }
 0x9ea   :  { %v3165_v3 = vadd.f32 %v3164_v2, %v3163_v0 }
 0x9ec   :  { %v3166_v4 = vrot.slane %v3165_v3, 1 }
 0x9ee   :  { %v3167_v5 = vadd.f32 %v3166_v4, %v3165_v3 }
 0x9f0   :  { %3169 = vst.msk [vmem:[#allocation2] sm:$0x1] %vm3168_vm10, %v3167_v5 }
 0x9f1   :  { %4599 = shalt.err (!%p4596_p4)
}
 0x9f2   :  { %s4600_s15 = scalar_lea.hbm %s5455_s6, 16 }
 0x9f3   :  { %p4601_p5 = scmp.ne.s32.totalorder %s5455_s6, %s4600_s15  ;;  %p4604_p6 = scmp.lt.u32.totalorder %s4600_s15, %s5455_s6 }
 0x9f5   :  { %p4606_p7 = pnand %p4604_p6, %p4601_p5 }
 0x9f7   :  { %4609 = shalt.err (!%p4606_p7)
}
 0x9f8   :  { %3179 = dma.vmem_to_hbm [thread:$0]  %s3177_s10, 16, %s5455_s6, [#allocation3]  }
 0x9f9   :  { %4610 = dma.done.wait [#allocation3], 16  }
 0x9fa   :  { %4611 = vsyncadd [#allocation3], 4294967280 }
 0x9fb   :  { %3183 = vsyncpa [#allocation3], 1 }

</bundles_post_ra>
